<compile_context>
chip_gen: v5e
topology: v5e:2x2
jax: 0.10.0
libtpu: 0.0.40
codegen_flags: <defaults>
</compile_context>

<pallas_src>
import functools

import jax
import jax.numpy as jnp
from jax import lax
from jax.experimental import pallas as pl
from jax.experimental.pallas import tpu as pltpu


def _round_up(x, m):
    return ((x + m - 1) // m) * m


def _vq_kernel(x_ref, emb_ref, embt_ref, esq_ref,
               q_ref, idx_ref, stat_ref,
               *, cols_valid, block_cols, dist_in_bf16):
    x = x_ref[0]                                     # (D, TS), input dtype
    xf = x.astype(jnp.float32)
    emb_m2 = emb_ref[...]                            # (K, D), pre-scaled by -2 (bf16 or f32)
    emb_t = embt_ref[...]                            # (D, K), f32 codebook (exact lookup)
    e_sq = esq_ref[...]                              # (K, 1), f32

    num_codes = emb_m2.shape[0]

    # dist^T[k, t] = ||e_k||^2 - 2 e_k . x_t ; per-column ||x_t||^2 is constant in k and
    # cannot change the argmin, so it is dropped.
    x_mm = x.astype(jnp.bfloat16) if dist_in_bf16 else xf
    xe = jnp.dot(emb_m2, x_mm, preferred_element_type=jnp.float32)    # (K, TS) on MXU
    dist = xe + e_sq                                                  # (K, TS), one VPU pass

    # First-minimum index along the code (sublane) axis — matches torch.argmin tie-breaking.
    row = lax.broadcasted_iota(jnp.int32, dist.shape, 0)              # (K, TS) int32
    dmin = jnp.min(dist, axis=0, keepdims=True)                       # (1, TS)
    idx = jnp.min(jnp.where(dist == dmin, row, num_codes),
                  axis=0, keepdims=True)                              # (1, TS) int32

    onehot = (row == idx).astype(jnp.float32)                         # (K, TS)
    q = jnp.dot(emb_t, onehot, preferred_element_type=jnp.float32)    # (D, TS) on MXU, exact

    q_ref[0] = q.astype(q_ref.dtype)
    idx_ref[0] = idx                                                  # lane-dense store

    # Fused statistics (commitment-loss numerator + code-usage counts), padded cols masked.
    col0 = pl.program_id(1) * block_cols
    cid = col0 + lax.broadcasted_iota(jnp.int32, (1, x.shape[1]), 1)  # (1, TS)
    validf = (cid < cols_valid).astype(jnp.float32)                   # (1, TS)

    diff = (q - xf) * validf                                          # (D, TS)
    sq = jnp.full(stat_ref.shape, jnp.sum(diff * diff), dtype=jnp.float32)
    cnt = jnp.sum(onehot * validf, axis=1, keepdims=True)             # (K, 1)

    lane = lax.broadcasted_iota(jnp.int32, stat_ref.shape, 1)         # (K, 8)
    stat_ref[...] = jnp.where(lane == 0, cnt, jnp.where(lane == 1, sq, 0.0))


@functools.partial(jax.jit,
                   static_argnames=("commitment_cost", "block_cols", "dist_in_bf16"))
def sampler_vq_forward(x, codebook, commitment_cost=0.25, block_cols=1024,
                       dist_in_bf16=True):
    """SamplerVQ.forward (flatten/unflatten = None): returns the quantized tensor (the
    module's `ret`, forward value of the straight-through estimator) plus the side
    quantities the module stores as attributes (vq_loss, perplexity, encoding indices)."""
    n, c, h, w = x.shape
    k, d = codebook.shape
    assert c == d, "channel dim must equal the embedding dim"
    assert k % 8 == 0, "num_embeddings must be a multiple of 8"
    hw = h * w

    # NCHW -> (N, C, H*W): free, contiguous reshape — no transpose, no extra HBM pass.
    x3 = x.reshape(n, c, hw)

    hw_pad = _round_up(hw, 128)
    ts = min(block_cols, hw_pad)                     # spatial columns per grid step
    s = -(-hw_pad // ts)                             # spatial tiles per image
    hw_pad = s * ts
    if hw_pad != hw:
        x3 = jnp.pad(x3, ((0, 0), (0, 0), (0, hw_pad - hw)))

    emb_f32 = codebook.astype(jnp.float32)
    emb_m2 = -2.0 * emb_f32                          # fold the -2 on the host
    if dist_in_bf16:
        emb_m2 = emb_m2.astype(jnp.bfloat16)         # bf16 MXU distance matmul
    emb_t = emb_f32.T                                # (D, K): exact f32 code lookup
    e_sq = jnp.sum(emb_f32 * emb_f32, axis=1, keepdims=True)   # (K, 1)

    kernel = functools.partial(_vq_kernel, cols_valid=hw, block_cols=ts,
                               dist_in_bf16=dist_in_bf16)

    q3, idx3, stat = pl.pallas_call(
        kernel,
        grid=(n, s),
        in_specs=[
            pl.BlockSpec((1, d, ts), lambda i, j: (i, 0, j)),   # activations (pipelined)
            pl.BlockSpec((k, d), lambda i, j: (0, 0)),          # -2*E        (VMEM resident)
            pl.BlockSpec((d, k), lambda i, j: (0, 0)),          # E^T         (VMEM resident)
            pl.BlockSpec((k, 1), lambda i, j: (0, 0)),          # ||E||^2     (VMEM resident)
        ],
        out_specs=(
            pl.BlockSpec((1, d, ts), lambda i, j: (i, 0, j)),   # quantized (same layout as x)
            pl.BlockSpec((1, 1, ts), lambda i, j: (i, 0, j)),   # indices (lane-dense)
            pl.BlockSpec((k, 8), lambda i, j, _s=s: (i * _s + j, 0)),  # per-tile stats
        ),
        out_shape=(
            jax.ShapeDtypeStruct((n, d, hw_pad), x.dtype),
            jax.ShapeDtypeStruct((n, 1, hw_pad), jnp.int32),
            jax.ShapeDtypeStruct((n * s * k, 8), jnp.float32),
        ),
        compiler_params=pltpu.CompilerParams(
            dimension_semantics=("parallel", "parallel"),   # disjoint outputs -> megacore ok
            vmem_limit_bytes=32 * 1024 * 1024,              # ~3 MiB used; safe on v7x (64 MiB)
        ),
    )(x3, emb_m2, emb_t, e_sq)
    # NOTE: if the input DMA turns out exposed in a trace, add
    # pipeline_mode=pl.Buffered(3) to the x in_spec (plenty of VMEM headroom).

    ret = q3[:, :, :hw].reshape(n, c, h, w)          # still NCHW; reshape is free
    indices = idx3[:, 0, :hw].reshape(-1)            # (N*H*W,), same order as NHWC flatten

    stat = stat.reshape(n * s, k, 8)
    counts = jnp.sum(stat[:, :, 0], axis=0)          # (K,) code-usage counts
    sq_sum = jnp.sum(stat[:, 0, 1])                  # sum ||q - x||^2 over valid positions

    m = n * hw
    e_latent_loss = sq_sum / (m * d)                 # mse(quantized.detach(), inputs)
    vq_loss = commitment_cost * e_latent_loss
    avg_probs = counts / m
    perplexity = jnp.exp(-jnp.sum(avg_probs * jnp.log(avg_probs + 1e-10)))

    aux = {"loss": vq_loss, "perplexity": perplexity, "encoding_indices": indices}
    return ret, aux


if __name__ == "__main__":
    key = jax.random.PRNGKey(0)
    k_x, k_e = jax.random.split(key)

    # Small demo consistent with SamplerVQ: dim (= channels) 128, 256 codes.
    n, dim, h, w = 4, 128, 16, 16
    vq_params = {"num_embeddings": 256, "commitment_cost": 0.25, "decay": 0.99}

    x = jax.random.normal(k_x, (n, dim, h, w), dtype=jnp.float32)
    codebook = jax.random.normal(k_e, (vq_params["num_embeddings"], dim), dtype=jnp.float32)

    ret, aux = sampler_vq_forward(x, codebook,
                                  commitment_cost=vq_params["commitment_cost"])
    jax.block_until_ready(ret)

    # Pure-JAX reference of the canonical VectorQuantizerEMA forward math (full f32).
    xf = jnp.transpose(x, (0, 2, 3, 1)).reshape(-1, dim)
    dist = (jnp.sum(xf * xf, axis=1, keepdims=True)
            + jnp.sum(codebook * codebook, axis=1)[None, :]
            - 2.0 * jnp.dot(xf, codebook.T, precision=jax.lax.Precision.HIGHEST))
    idx_expected = jnp.argmin(dist, axis=1)
    q_expected = codebook[idx_expected]
    loss_expected = vq_params["commitment_cost"] * jnp.mean((q_expected - xf) ** 2)
    probs = jnp.mean(jax.nn.one_hot(idx_expected, vq_params["num_embeddings"],
                                    dtype=jnp.float32), axis=0)
    perp_expected = jnp.exp(-jnp.sum(probs * jnp.log(probs + 1e-10)))

    assert ret.shape == x.shape and ret.dtype == x.dtype

    same = aux["encoding_indices"] == idx_expected
    match = float(jnp.mean(same.astype(jnp.float32)))
    # bf16 distance matmul can flip a handful of near-tie argmin decisions vs f32 HIGHEST.
    assert match >= 0.99, f"index match {match}"

    q_kernel_flat = jnp.transpose(ret, (0, 2, 3, 1)).reshape(-1, dim)
    masked_err = jnp.where(same[:, None], jnp.abs(q_kernel_flat - q_expected), 0.0)
    assert float(jnp.max(masked_err)) < 1e-3
    assert bool(jnp.allclose(aux["loss"], loss_expected, atol=2e-4, rtol=2e-3))
    assert bool(jnp.allclose(aux["perplexity"], perp_expected, atol=0.5, rtol=2e-2))

    print("KERNEL_OK")
</pallas_src>

<mosaic_0001>
module attributes {stable_mosaic.version = 11 : i64} {
  func.func @_vq_kernel(%arg0: i32, %arg1: i32, %arg2: memref<1x128x256xf32, #tpu.memory_space<vmem>>, %arg3: memref<256x128xbf16, #tpu.memory_space<vmem>>, %arg4: memref<128x256xf32, #tpu.memory_space<vmem>>, %arg5: memref<256x1xf32, #tpu.memory_space<vmem>>, %arg6: memref<1x128x256xf32, #tpu.memory_space<vmem>>, %arg7: memref<1x1x256xi32, #tpu.memory_space<vmem>>, %arg8: memref<256x8xf32, #tpu.memory_space<vmem>>) attributes {dimension_semantics = [#tpu.dimension_semantics<parallel>, #tpu.dimension_semantics<parallel>], iteration_bounds = array<i64: 4, 1>, scalar_prefetch = 0 : i64, scratch_operands = 0 : i64, tpu.core_type = #tpu.core_type<tc>, window_params = [{transform_indices = @transform_0, window_bounds = array<i64: 1, 128, 256>}, {pipeline_mode = #tpu.pipeline_mode<synchronous>, transform_indices = @transform_1, window_bounds = array<i64: 256, 128>}, {pipeline_mode = #tpu.pipeline_mode<synchronous>, transform_indices = @transform_2, window_bounds = array<i64: 128, 256>}, {pipeline_mode = #tpu.pipeline_mode<synchronous>, transform_indices = @transform_3, window_bounds = array<i64: 256, 1>}, {transform_indices = @transform_4, window_bounds = array<i64: 1, 128, 256>}, {transform_indices = @transform_5, window_bounds = array<i64: 1, 1, 256>}, {transform_indices = @transform_6, window_bounds = array<i64: 256, 8>}]} {
    %c0 = arith.constant 0 : index
    %c0_0 = arith.constant 0 : index
    %c0_1 = arith.constant 0 : index
    %0 = vector.load %arg2[%c0, %c0_0, %c0_1] : memref<1x128x256xf32, #tpu.memory_space<vmem>>, vector<1x128x256xf32>
    %1 = vector.shape_cast %0 : vector<1x128x256xf32> to vector<128x256xf32>
    %c0_2 = arith.constant 0 : index
    %c0_3 = arith.constant 0 : index
    %2 = vector.load %arg3[%c0_2, %c0_3] : memref<256x128xbf16, #tpu.memory_space<vmem>>, vector<256x128xbf16>
    %c0_4 = arith.constant 0 : index
    %c0_5 = arith.constant 0 : index
    %3 = vector.load %arg4[%c0_4, %c0_5] : memref<128x256xf32, #tpu.memory_space<vmem>>, vector<128x256xf32>
    %c0_6 = arith.constant 0 : index
    %c0_7 = arith.constant 0 : index
    %4 = vector.load %arg5[%c0_6, %c0_7] : memref<256x1xf32, #tpu.memory_space<vmem>>, vector<256x1xf32>
    %5 = arith.truncf %1 : vector<128x256xf32> to vector<128x256xbf16>
    %cst = arith.constant dense<0.000000e+00> : vector<256x256xf32>
    %6 = tpu.matmul %2, %5, %cst {dimension_numbers = #tpu.dot_dimension_numbers<[1], [0], [0], [1], [0, 0, 1, 1], [], []>} : vector<256x128xbf16>, vector<128x256xbf16>, vector<256x256xf32> -> vector<256x256xf32>
    %7 = vector.broadcast %4 : vector<256x1xf32> to vector<256x256xf32>
    %8 = arith.addf %6, %7 : vector<256x256xf32>
    %9 = tpu.iota {dimensions = array<i32: 0>} : vector<256x256xi32>
    %cst_8 = arith.constant dense<0x7F800000> : vector<256xf32>
    %10 = vector.multi_reduction <minimumf>, %8, %cst_8 [0] : vector<256x256xf32> to vector<256xf32>
    %11 = vector.shape_cast %10 : vector<256xf32> to vector<1x256xf32>
    %12 = vector.broadcast %11 : vector<1x256xf32> to vector<256x256xf32>
    %13 = arith.cmpf oeq, %8, %12 : vector<256x256xf32>
    %c256_i32 = arith.constant 256 : i32
    %14 = vector.broadcast %c256_i32 : i32 to vector<256x256xi32>
    %15 = arith.select %13, %9, %14 : vector<256x256xi1>, vector<256x256xi32>
    %cst_9 = arith.constant dense<2147483647> : vector<256xi32>
    %16 = vector.multi_reduction <minsi>, %15, %cst_9 [0] : vector<256x256xi32> to vector<256xi32>
    %17 = vector.shape_cast %16 : vector<256xi32> to vector<1x256xi32>
    %18 = vector.broadcast %17 : vector<1x256xi32> to vector<256x256xi32>
    %19 = arith.cmpi eq, %9, %18 : vector<256x256xi32>
    %20 = arith.extui %19 : vector<256x256xi1> to vector<256x256xi32>
    %21 = arith.sitofp %20 : vector<256x256xi32> to vector<256x256xf32>
    %cst_10 = arith.constant dense<0.000000e+00> : vector<128x256xf32>
    %22 = tpu.matmul %3, %21, %cst_10 {dimension_numbers = #tpu.dot_dimension_numbers<[1], [0], [0], [1], [0, 0, 1, 1], [], []>} : vector<128x256xf32>, vector<256x256xf32>, vector<128x256xf32> -> vector<128x256xf32>
    %c0_11 = arith.constant 0 : index
    %c0_12 = arith.constant 0 : index
    %c0_13 = arith.constant 0 : index
    %23 = vector.load %arg6[%c0_11, %c0_12, %c0_13] : memref<1x128x256xf32, #tpu.memory_space<vmem>>, vector<1x128x256xf32>
    %24 = vector.shape_cast %23 : vector<1x128x256xf32> to vector<128x256xf32>
    %25 = vector.shape_cast %22 : vector<128x256xf32> to vector<1x128x256xf32>
    tpu.vector_store %arg6[%c0_11, %c0_12, %c0_13], %25 {strides = array<i32>} : memref<1x128x256xf32, #tpu.memory_space<vmem>>, vector<1x128x256xf32>,
    %c0_14 = arith.constant 0 : index
    %c0_15 = arith.constant 0 : index
    %c0_16 = arith.constant 0 : index
    %26 = vector.load %arg7[%c0_14, %c0_15, %c0_16] : memref<1x1x256xi32, #tpu.memory_space<vmem>>, vector<1x1x256xi32>
    %27 = vector.shape_cast %26 : vector<1x1x256xi32> to vector<1x256xi32>
    %28 = vector.shape_cast %17 : vector<1x256xi32> to vector<1x1x256xi32>
    tpu.vector_store %arg7[%c0_14, %c0_15, %c0_16], %28 {strides = array<i32>} : memref<1x1x256xi32, #tpu.memory_space<vmem>>, vector<1x1x256xi32>,
    %c256_i32_17 = arith.constant 256 : i32
    %29 = arith.muli %arg1, %c256_i32_17 : i32
    %30 = tpu.iota {dimensions = array<i32: 1>} : vector<1x256xi32>
    %31 = vector.broadcast %29 : i32 to vector<1x256xi32>
    %32 = arith.addi %31, %30 : vector<1x256xi32>
    %c256_i32_18 = arith.constant 256 : i32
    %33 = vector.broadcast %c256_i32_18 : i32 to vector<1x256xi32>
    %34 = arith.cmpi slt, %32, %33 : vector<1x256xi32>
    %35 = arith.extui %34 : vector<1x256xi1> to vector<1x256xi32>
    %36 = arith.sitofp %35 : vector<1x256xi32> to vector<1x256xf32>
    %37 = arith.subf %22, %1 : vector<128x256xf32>
    %38 = vector.broadcast %36 : vector<1x256xf32> to vector<128x256xf32>
    %39 = arith.mulf %37, %38 : vector<128x256xf32>
    %40 = arith.mulf %39, %39 : vector<128x256xf32>
    %41 = vector.shape_cast %40 : vector<128x256xf32> to vector<1x128x256xf32>
    %cst_19 = arith.constant dense<0.000000e+00> : vector<1xf32>
    %42 = vector.multi_reduction <add>, %41, %cst_19 [1, 2] : vector<1x128x256xf32> to vector<1xf32>
    %43 = vector.shape_cast %42 : vector<1xf32> to vector<1x1x1xf32>
    %44 = vector.extract %43[0, 0, 0] : f32 from vector<1x1x1xf32>
    %45 = vector.broadcast %44 : f32 to vector<256x8xf32>
    %46 = vector.broadcast %36 : vector<1x256xf32> to vector<256x256xf32>
    %47 = arith.mulf %21, %46 : vector<256x256xf32>
    %cst_20 = arith.constant dense<0.000000e+00> : vector<256xf32>
    %48 = vector.multi_reduction <add>, %47, %cst_20 [1] : vector<256x256xf32> to vector<256xf32>
    %49 = vector.shape_cast %48 : vector<256xf32> to vector<256x1xf32>
    %50 = tpu.iota {dimensions = array<i32: 1>} : vector<256x8xi32>
    %c0_i32 = arith.constant 0 : i32
    %51 = vector.broadcast %c0_i32 : i32 to vector<256x8xi32>
    %52 = arith.cmpi eq, %50, %51 : vector<256x8xi32>
    %c1_i32 = arith.constant 1 : i32
    %53 = vector.broadcast %c1_i32 : i32 to vector<256x8xi32>
    %54 = arith.cmpi eq, %50, %53 : vector<256x8xi32>
    %cst_21 = arith.constant 0.000000e+00 : f32
    %55 = vector.broadcast %cst_21 : f32 to vector<256x8xf32>
    %56 = arith.select %54, %45, %55 : vector<256x8xi1>, vector<256x8xf32>
    %57 = vector.shape_cast %49 : vector<256x1xf32> to vector<256x1xf32>
    %58 = vector.broadcast %57 : vector<256x1xf32> to vector<256x8xf32>
    %59 = arith.select %52, %58, %56 : vector<256x8xi1>, vector<256x8xf32>
    %c0_22 = arith.constant 0 : index
    %c0_23 = arith.constant 0 : index
    %60 = vector.load %arg8[%c0_22, %c0_23] : memref<256x8xf32, #tpu.memory_space<vmem>>, vector<256x8xf32>
    tpu.vector_store %arg8[%c0_22, %c0_23], %59 {strides = array<i32>} : memref<256x8xf32, #tpu.memory_space<vmem>>, vector<256x8xf32>,
    return
  }
  func.func @transform_0(%arg0: i32, %arg1: i32) -> (i32, i32, i32) {
    %c0_i32 = arith.constant 0 : i32
    %c0_i32_0 = arith.constant 0 : i32
    return %arg0, %c0_i32, %arg1 : i32, i32, i32
  }
  func.func @transform_1(%arg0: i32, %arg1: i32) -> (i32, i32) {
    %c0_i32 = arith.constant 0 : i32
    %c0_i32_0 = arith.constant 0 : i32
    %c0_i32_1 = arith.constant 0 : i32
    return %c0_i32, %c0_i32_0 : i32, i32
  }
  func.func @transform_2(%arg0: i32, %arg1: i32) -> (i32, i32) {
    %c0_i32 = arith.constant 0 : i32
    %c0_i32_0 = arith.constant 0 : i32
    %c0_i32_1 = arith.constant 0 : i32
    return %c0_i32, %c0_i32_0 : i32, i32
  }
  func.func @transform_3(%arg0: i32, %arg1: i32) -> (i32, i32) {
    %c0_i32 = arith.constant 0 : i32
    %c0_i32_0 = arith.constant 0 : i32
    %c0_i32_1 = arith.constant 0 : i32
    return %c0_i32, %c0_i32_0 : i32, i32
  }
  func.func @transform_4(%arg0: i32, %arg1: i32) -> (i32, i32, i32) {
    %c0_i32 = arith.constant 0 : i32
    %c0_i32_0 = arith.constant 0 : i32
    return %arg0, %c0_i32, %arg1 : i32, i32, i32
  }
  func.func @transform_5(%arg0: i32, %arg1: i32) -> (i32, i32, i32) {
    %c0_i32 = arith.constant 0 : i32
    %c0_i32_0 = arith.constant 0 : i32
    return %arg0, %c0_i32, %arg1 : i32, i32, i32
  }
  func.func @transform_6(%arg0: i32, %arg1: i32) -> (i32, i32) {
    %c1_i32 = arith.constant 1 : i32
    %0 = arith.muli %arg0, %c1_i32 : i32
    %1 = arith.addi %0, %arg1 : i32
    %c0_i32 = arith.constant 0 : i32
    %c0_i32_0 = arith.constant 0 : i32
    return %1, %c0_i32 : i32, i32
  }
}

</mosaic_0001>

<bundles_post_ra>
// kernel: sampler_vq_forward.1
= control target key start
LH: loop header
LB: loop body
LE: loop exit
PB: predicated region body
PF: predicated region fallthrough
CT: control target
= control target key end

     0   :  { %12 = vsyncpa [#allocation3], 0  ;;  %s5048_s0 = inlined_call_operand.vmem [shape: f32[4,128,256], index: 0, kind: input, shape index: {}]   ;;  %s5049_s1 = inlined_call_operand.vmem [shape: bf16[256,128], index: 1, kind: input, shape index: {}]   ;;  %s5050_s2 = inlined_call_operand.vmem [shape: f32[128,256], index: 2, kind: input, shape index: {}]   ;;  %s5051_s3 = inlined_call_operand.vmem [shape: f32[256,1], index: 3, kind: input, shape index: {}]   ;;  %s5052_s4 = inlined_call_operand.vmem [shape: f32[4,128,256], index: 4, kind: output, shape index: {0}]   ;;  %s5053_s5 = inlined_call_operand.hbm [shape: s32[4,1,256], index: 5, kind: output, shape index: {1}]   ;;  %s5054_s6 = inlined_call_operand.vmem [shape: f32[1024,8], index: 6, kind: output, shape index: {2}]  }
   0x1   :  { %14 = vsyncpa [#allocation3 + $0x1], 0  ;;  %s2767_s21 = smov 0   ;;  %s2769_s22 = smov 0  }
   0x2   :  { %s2771_s23 = smov 0   ;;  %s2773_s24 = smov 0  }
   0x3   :  { %s2775_s25 = smov 0   ;;  %s2777_s26 = smov 0  }
   0x4 LB: > { %s2328_s27 = sadd.s32 4294967295, %s2727_s26   ;;  %s2329_s28 = sadd.s32 4294967294, %s2727_s26   ;;  %s2727_s26 = sphi %s2777_s26, %s20_s26   ;;  %s2723_s25 = sphi %s2775_s25, %s5336_s25   ;;  %s2719_s24 = sphi %s2773_s24, %s5335_s24   ;;  %s2715_s23 = sphi %s2771_s23, %s5334_s23   ;;  %s2711_s22 = sphi %s2769_s22, %s5333_s22   ;;  %s2707_s21 = sphi %s2767_s21, %s5332_s21  }
   0x5   : > { %s32_s29 = sadd.s32 1, %s2723_s25  ;;  %s160_s30 = sadd.s32 1, %s2715_s23 }
   0x6   : > { %p34_p0 = scmp.ge.s32.totalorder %s32_s29, 4  ;;  %p170_p1 = scmp.ne.s32.totalorder %s2715_s23, %s2711_s22 }
   0x7   : > { %p171_p2 = scmp.eq.s32.totalorder %s2328_s27, 3  ;;  %p176_p3 = scmp.ne.s32.totalorder %s2711_s22, %s2707_s21 }
   0x8   : > { %s5338_s29 = smov (%p34_p0, %s32_s29), 0  ;;  %p177_p5 = scmp.eq.s32.totalorder %s2329_s28, 3 }
   0x9   : > { %p2807_p4 = por %p171_p2, %p170_p1  ;;  %s155_s8 = ssub.s32 %s2723_s25, %s5338_s29 }
   0xa   : > { %p2332_p6 = scmp.ge.s32.totalorder %s2727_s26, 1  ;;  %p158_p7 = scmp.eq.s32.totalorder %s155_s8, 0 }
   0xb   : > { %p2814_p8 = por %p177_p5, %p176_p3  ;;  %p245_p9 = scmp.lt.s32.totalorder %s2727_s26, 5 }
   0xc   : > { %s2820_s10 = scalar_select %p158_p7, %s2715_s23, %s160_s30  }
   0xd   : > { %p246_p10 = pnand %p2332_p6, %p245_p9 }
   0xf   : > { %249 = sbr.rel (%p246_p10) target bundleno = 1152 (0x480), region = 36 }
  0x14   : > { %p295_p11 = scmp.lt.s32.totalorder %s2719_s24, 3  ;;  %v2729_v14 = vmov 0   ;;  %v419_v24 = vld [vmem:[%s5051_s3] sm:$0xff]  ;;  %v420_v37 = vld [vmem:[%s5051_s3 + $0x8] sm:$0xff]  ;;  %v421_v38 = vld [vmem:[%s5051_s3 + $0x10] sm:$0xff]  ;;  %s283_s27 = sand.u32 1, %s2711_s22  }
  0x15   : > { %2614 = vset.pattern.permute.xlu0 %v2729_v14  ;;  %2615 = vset.pattern.permute.xlu1 %v2729_v14  ;;  %v2538_v52 = vld [vmem:[%s5049_s1] sm:$0xff]  ;;  %v422_v53 = vld [vmem:[%s5051_s3 + $0x18] sm:$0xff]  ;;  %v2539_v54 = vld [vmem:[%s5049_s1 + $0x8] sm:$0xff]  ;;  %s4320_s28 = sshll.u32 %s283_s27, 1  ;;  %s2158_s19 = scalar_lea.sflag [#allocation3], %s283_s27 }
  0x16   : > { %s2824_s11 = scalar_select %p295_p11, %s2719_s24, 3  ;;  %2616 = vset.pattern.permute.xlu2 %v2729_v14  ;;  %469 = vperm.xlu0 %2614, %v419_v24   ;;  %v425_v55 = vld [vmem:[%s5051_s3 + $0x30] sm:$0xff]  ;;  %v423_v57 = vld [vmem:[%s5051_s3 + $0x20] sm:$0xff]  ;;  %v426_v58 = vld [vmem:[%s5051_s3 + $0x38] sm:$0xff] }
  0x17   : > { %479 = vperm.xlu1 %2615, %v421_v38   ;;  %v2540_v56 = vld [vmem:[%s5049_s1 + $0x10] sm:$0xff]  ;;  %489 = vperm.xlu2 %2616, %v423_v57   ;;  %v424_v59 = vld [vmem:[%s5051_s3 + $0x28] sm:$0xff]  ;;  %v2541_v60 = vld [vmem:[%s5049_s1 + $0x18] sm:$0xff]  ;;  %s285_s16 = scalar_lea.vmem [#allocation2], %s4320_s28 }
  0x18   : > { %s2536_s12 = sshll.u32 %s2824_s11, 8  ;;  %v428_v61 = vld [vmem:[%s5051_s3 + $0x48] sm:$0xff]  ;;  %v429_v62 = vld [vmem:[%s5051_s3 + $0x50] sm:$0xff]  ;;  %v2542_v63 = vld [vmem:[%s5049_s1 + $0x20] sm:$0xff]  ;;  %s2533_s11 = sshll.u32 %s2719_s24, 1 }
  0x19   : > { %s2832_s15 = scalar_lea.vmem %s5048_s0, %s2536_s12  ;;  %v449_v38 = vld [vmem:[%s5051_s3 + $0xf0] sm:$0xff]  ;;  %s4667_s13 = scalar_lea.vmem %s5052_s4, %s2536_s12 }
  0x1a   : > { %v351_v0 = vld [vmem:[%s2832_s15 + $0xe0] sm:$0xff]  ;;  %v353_v1 = vld [vmem:[%s2832_s15 + $0xf0] sm:$0xff]  ;;  %v352_v2 = vld [vmem:[%s2832_s15 + $0xe8] sm:$0xff]  ;;  %s2180_s14 = scalar_lea.hbm %s5053_s5, %s2533_s11  ;;  %s2182_s17 = sshll.u32 %s285_s16, 4  ;;  %s2183_s17 = int_to_ptr.vmem [resolvable:$true] %s2182_s17 }
  0x1b   : > { %v465_v3 = vpack.c.bf16 %v353_v1, %v351_v0  ;;  %v354_v4 = vld [vmem:[%s2832_s15 + $0xf8] sm:$0xff]  ;;  %v347_v5 = vld [vmem:[%s2832_s15 + $0xc0] sm:$0xff]  ;;  %v349_v6 = vld [vmem:[%s2832_s15 + $0xd0] sm:$0xff]  ;;  %s2184_s18 = sshll.u32 %s2180_s14, 4  ;;  %s2669_s12 = scalar_lea.hbm %s5053_s5, 8  ;;  %s2185_s18 = int_to_ptr.hbm [resolvable:$true] %s2184_s18 }
  0x1c   : > { %v466_v7 = vpack.c.bf16 %v354_v4, %v352_v2  ;;  %v348_v8 = vld [vmem:[%s2832_s15 + $0xc8] sm:$0xff]  ;;  %v350_v9 = vld [vmem:[%s2832_s15 + $0xd8] sm:$0xff]  ;;  %v463_v10 = vpack.c.bf16 %v349_v6, %v347_v5  ;;  %v343_v12 = vld [vmem:[%s2832_s15 + $0xa0] sm:$0xff]  ;;  %s2663_s20 = sshra.s32 %s2185_s18, 4  ;;  %s2664_s20 = int_to_ptr.hbm [resolvable:$true] %s2663_s20 }
  0x1d   : > { %723 = vmatpush.bf16.msra.mxu0 %v465_v3  ;;  %v464_v11 = vpack.c.bf16 %v350_v9, %v348_v8  ;;  %v345_v13 = vld [vmem:[%s2832_s15 + $0xb0] sm:$0xff]  ;;  %v344_v15 = vld [vmem:[%s2832_s15 + $0xa8] sm:$0xff]  ;;  %v346_v16 = vld [vmem:[%s2832_s15 + $0xb8] sm:$0xff]  ;;  %s2665_s30 = scalar_lea.hbm %s2664_s20, 2  ;;  %p2670_p1 = scmp.lt.s32.totalorder %s2664_s20, %s5053_s5 }
  0x1e   : > { %812 = vmatpush.bf16.msra.mxu1 %v466_v7  ;;  %v461_v17 = vpack.c.bf16 %v345_v13, %v343_v12  ;;  %v462_v18 = vpack.c.bf16 %v346_v16, %v344_v15  ;;  %v339_v19 = vld [vmem:[%s2832_s15 + $0x80] sm:$0xff]  ;;  %v341_v20 = vld [vmem:[%s2832_s15 + $0x90] sm:$0xff]  ;;  %v340_v21 = vld [vmem:[%s2832_s15 + $0x88] sm:$0xff]  ;;  %474 = vperm.xlu0 %2614, %v420_v37   ;;  %p2666_p12 = scmp.ne.s32.totalorder %s2664_s20, %s2665_s30  ;;  %p2671_p2 = scmp.lt.s32.totalorder %s2669_s12, %s2665_s30 }
  0x1f   : > { %v342_v22 = vld [vmem:[%s2832_s15 + $0x98] sm:$0xff]  ;;  %v459_v23 = vpack.c.bf16 %v341_v20, %v339_v19  ;;  %v335_v26 = vld [vmem:[%s2832_s15 + $0x60] sm:$0xff]  ;;  %v337_v27 = vld [vmem:[%s2832_s15 + $0x70] sm:$0xff]  ;;  %484 = vperm.xlu1 %2615, %v422_v53   ;;  %494 = vperm.xlu2 %2616, %v424_v59  }
  0x20   : > { %v460_v25 = vpack.c.bf16 %v342_v22, %v340_v21  ;;  %v336_v28 = vld [vmem:[%s2832_s15 + $0x68] sm:$0xff]  ;;  %v338_v29 = vld [vmem:[%s2832_s15 + $0x78] sm:$0xff]  ;;  %v457_v30 = vpack.c.bf16 %v337_v27, %v335_v26  ;;  %v331_v32 = vld [vmem:[%s2832_s15 + $0x40] sm:$0xff]  ;;  %p2667_p13 = pnand %p2666_p12, %p2807_p4  ;;  %p2672_p3 = por %p2671_p2, %p2670_p1 }
  0x21   : > { %724 = vmatpush.bf16.msra.mxu0 %v463_v10  ;;  %v458_v31 = vpack.c.bf16 %v338_v29, %v336_v28  ;;  %v333_v33 = vld [vmem:[%s2832_s15 + $0x50] sm:$0xff]  ;;  %v332_v34 = vld [vmem:[%s2832_s15 + $0x48] sm:$0xff]  ;;  %v334_v35 = vld [vmem:[%s2832_s15 + $0x58] sm:$0xff] }
  0x22   : > { %813 = vmatpush.bf16.msra.mxu1 %v464_v11  ;;  %v455_v36 = vpack.c.bf16 %v333_v33, %v331_v32  ;;  %v456_v39 = vpack.c.bf16 %v334_v35, %v332_v34  ;;  %v327_v40 = vld [vmem:[%s2832_s15 + $0x20] sm:$0xff]  ;;  %v329_v41 = vld [vmem:[%s2832_s15 + $0x30] sm:$0xff]  ;;  %v328_v42 = vld [vmem:[%s2832_s15 + $0x28] sm:$0xff]  ;;  %p2668_p0 = pneg %p2667_p13 }
  0x23   : > { %v330_v43 = vld [vmem:[%s2832_s15 + $0x38] sm:$0xff]  ;;  %v453_v44 = vpack.c.bf16 %v329_v41, %v327_v40  ;;  %v323_v46 = vld [vmem:[%s2832_s15] sm:$0xff]  ;;  %v325_v47 = vld [vmem:[%s2832_s15 + $0x10] sm:$0xff] }
  0x24   : > { %v454_v45 = vpack.c.bf16 %v330_v43, %v328_v42  ;;  %v324_v48 = vld [vmem:[%s2832_s15 + $0x8] sm:$0xff]  ;;  %v326_v49 = vld [vmem:[%s2832_s15 + $0x18] sm:$0xff]  ;;  %v451_v50 = vpack.c.bf16 %v325_v47, %v323_v46  ;;  %v427_v0 = vld [vmem:[%s5051_s3 + $0x40] sm:$0xff]  ;;  %p2673_p5 = pnand %p2672_p3, %p2668_p0 }
  0x25   : > { %725 = vmatpush.bf16.msra.mxu0 %v461_v17  ;;  %v452_v51 = vpack.c.bf16 %v326_v49, %v324_v48  ;;  %v431_v1 = vld [vmem:[%s5051_s3 + $0x60] sm:$0xff]  ;;  %v2543_v2 = vld [vmem:[%s5049_s1 + $0x28] sm:$0xff]  ;;  %v430_v4 = vld [vmem:[%s5051_s3 + $0x58] sm:$0xff] }
  0x26   : > { %814 = vmatpush.bf16.msra.mxu1 %v462_v18  ;;  %499 = vperm.xlu0 %2614, %v425_v55   ;;  %v432_v3 = vld [vmem:[%s5051_s3 + $0x68] sm:$0xff]  ;;  %v2544_v5 = vld [vmem:[%s5049_s1 + $0x30] sm:$0xff]  ;;  %v434_v6 = vld [vmem:[%s5051_s3 + $0x78] sm:$0xff] }
  0x27   : > { %504 = vperm.xlu1 %2615, %v426_v58   ;;  %509 = vperm.xlu2 %2616, %v427_v0   ;;  %v435_v7 = vld [vmem:[%s5051_s3 + $0x80] sm:$0xff]  ;;  %v2545_v8 = vld [vmem:[%s5049_s1 + $0x38] sm:$0xff]  ;;  %v433_v9 = vld [vmem:[%s5051_s3 + $0x70] sm:$0xff] }
  0x28   : > { %v438_v10 = vld [vmem:[%s5051_s3 + $0x98] sm:$0xff]  ;;  %v437_v11 = vld [vmem:[%s5051_s3 + $0x90] sm:$0xff]  ;;  %v440_v13 = vld [vmem:[%s5051_s3 + $0xa8] sm:$0xff] }
  0x29   : > { %726 = vmatpush.bf16.msra.mxu0 %v459_v23  ;;  %v441_v12 = vld [vmem:[%s5051_s3 + $0xb0] sm:$0xff]  ;;  %v2546_v15 = vld [vmem:[%s5049_s1 + $0x40] sm:$0xff]  ;;  %v444_v19 = vld [vmem:[%s5051_s3 + $0xc8] sm:$0xff] }
  0x2a   : > { %815 = vmatpush.bf16.msra.mxu1 %v460_v25  ;;  %v443_v20 = vld [vmem:[%s5051_s3 + $0xc0] sm:$0xff]  ;;  %v436_v26 = vld [vmem:[%s5051_s3 + $0x88] sm:$0xff]  ;;  %v446_v28 = vld [vmem:[%s5051_s3 + $0xd8] sm:$0xff] }
  0x2b   : > { %v447_v27 = vld [vmem:[%s5051_s3 + $0xe0] sm:$0xff]  ;;  %v2547_v29 = vld [vmem:[%s5049_s1 + $0x48] sm:$0xff]  ;;  %v450_v37 = vld [vmem:[%s5051_s3 + $0xf8] sm:$0xff] }
  0x2c   : > { %v439_v48 = vld [vmem:[%s5051_s3 + $0xa0] sm:$0xff]  ;;  %v2548_v49 = vld [vmem:[%s5049_s1 + $0x50] sm:$0xff] }
  0x2d   : > { %727 = vmatpush.bf16.msra.mxu0 %v457_v30  ;;  %v445_v0 = vld [vmem:[%s5051_s3 + $0xd0] sm:$0xff] }
  0x2e   : > { %816 = vmatpush.bf16.msra.mxu1 %v458_v31  ;;  %514 = vperm.xlu0 %2614, %v428_v61  }
  0x2f   : > { %519 = vperm.xlu1 %2615, %v429_v62   ;;  %524 = vperm.xlu2 %2616, %v430_v4  }
  0x31   : > { %728 = vmatpush.bf16.msra.mxu0 %v455_v36 }
  0x32   : > { %817 = vmatpush.bf16.msra.mxu1 %v456_v39 }
  0x35   : > { %729 = vmatpush.bf16.msra.mxu0 %v453_v44 }
  0x36   : > { %818 = vmatpush.bf16.msra.mxu1 %v454_v45  ;;  %529 = vperm.xlu0 %2614, %v431_v1  }
  0x37   : > { %534 = vperm.xlu1 %2615, %v432_v3   ;;  %539 = vperm.xlu2 %2616, %v433_v9   ;;  %v448_v9 = vld [vmem:[%s5051_s3 + $0xe8] sm:$0xff] }
  0x39   : > { %730 = vmatpush.bf16.msra.mxu0 %v451_v50 }
  0x3a   : > { %819 = vmatpush.bf16.msra.mxu1 %v452_v51 }
  0x3c   : > { %731 = vmatmul.bf16.vlgmr.msra.gmra.mxu0 %v2538_v52 }
  0x3d   : > { %820 = vmatmul.bf16.vlgmr.msra.gmra.mxu1 %v2538_v52 }
  0x3e   : > { %544 = vperm.xlu0 %2614, %v434_v6  }
  0x3f   : > { %549 = vperm.xlu1 %2615, %v435_v7   ;;  %554 = vperm.xlu2 %2616, %v436_v26  }
  0x46   : > { %559 = vperm.xlu0 %2614, %v437_v11  }
  0x47   : > { %564 = vperm.xlu1 %2615, %v438_v10   ;;  %569 = vperm.xlu2 %2616, %v439_v48  }
  0x4c   : > { %736 = vmatmul.bf16.gmra.mxu0 %v2539_v54 }
  0x4d   : > { %825 = vmatmul.bf16.gmra.mxu1 %v2539_v54 }
  0x4e   : > { %574 = vperm.xlu0 %2614, %v440_v13  }
  0x4f   : > { %579 = vperm.xlu1 %2615, %v441_v12  }
  0x56   : > { %589 = vperm.xlu0 %2614, %v443_v20  }
  0x57   : > { %594 = vperm.xlu1 %2615, %v444_v19   ;;  %v2550_v19 = vld [vmem:[%s5049_s1 + $0x60] sm:$0xff] }
  0x5c   : > { %741 = vmatmul.bf16.gmra.mxu0 %v2540_v56 }
  0x5d   : > { %830 = vmatmul.bf16.gmra.mxu1 %v2540_v56  ;;  %v442_v56 = vld [vmem:[%s5051_s3 + $0xb8] sm:$0xff] }
  0x5e   : > { %604 = vperm.xlu0 %2614, %v446_v28   ;;  %584 = vperm.xlu2 %2616, %v442_v56  }
  0x5f   : > { %609 = vperm.xlu1 %2615, %v447_v27  }
  0x66   : > { %619 = vperm.xlu0 %2614, %v449_v38   ;;  %599 = vperm.xlu2 %2616, %v445_v0   ;;  %v2551_v38 = vld [vmem:[%s5049_s1 + $0x68] sm:$0xff] }
  0x67   : > { %624 = vperm.xlu1 %2615, %v450_v37  }
  0x6c   : > { %746 = vmatmul.bf16.gmra.mxu0 %v2541_v60 }
  0x6d   : > { %835 = vmatmul.bf16.gmra.mxu1 %v2541_v60 }
  0x6e   : > { %614 = vperm.xlu2 %2616, %v448_v9  }
  0x71   : > { %v490_v47 = vpop.permute.xlu2 %489 }
  0x79   : > { %v495_v57 = vpop.permute.xlu2 %494 }
  0x7c   : > { %751 = vmatmul.bf16.gmra.mxu0 %v2542_v63 }
  0x7d   : > { %840 = vmatmul.bf16.gmra.mxu1 %v2542_v63 }
  0x88   : > { %v470_v14 = vpop.permute.xlu0 %469 }
  0x89   : > { %v480_v25 = vpop.permute.xlu1 %479 }
  0x8c   : > { %756 = vmatmul.bf16.gmra.mxu0 %v2543_v2 }
  0x8d   : > { %845 = vmatmul.bf16.gmra.mxu1 %v2543_v2  ;;  %v2549_v2 = vld [vmem:[%s5049_s1 + $0x58] sm:$0xff] }
  0x90   : > { %v475_v22 = vpop.permute.xlu0 %474 }
  0x91   : > { %v485_v39 = vpop.permute.xlu1 %484 }
  0x98   : > { %v500_v1 = vpop.permute.xlu0 %499 }
  0x99   : > { %v505_v10 = vpop.permute.xlu1 %504 }
  0x9c   : > { %761 = vmatmul.bf16.gmra.mxu0 %v2544_v5 }
  0x9d   : > { %850 = vmatmul.bf16.gmra.mxu1 %v2544_v5 }
  0xa0   : > { %v515_v27 = vpop.permute.xlu0 %514 }
  0xa1   : > { %v520_v37 = vpop.permute.xlu1 %519 }
  0xac   : > { %766 = vmatmul.bf16.gmra.mxu0 %v2545_v8 }
  0xad   : > { %855 = vmatmul.bf16.gmra.mxu1 %v2545_v8 }
  0xb9   : > { %v732_v16 = vpop.f32.mrf.mxu0 }
  0xba   : > { %v821_v17 = vpop.f32.mrf.mxu1  ;;  %v2978_v31 = vadd.f32 %v732_v16, %v470_v14 }
  0xbb   : > { %v2956_v18 = vadd.f32 %v821_v17, %v470_v14  ;;  %v510_v17 = vpop.permute.xlu2 %509 }
  0xbc   : > { %771 = vmatmul.bf16.gmra.mxu0 %v2546_v15 }
  0xbd   : > { %860 = vmatmul.bf16.gmra.mxu1 %v2546_v15 }
  0xc1   : > { %v734_v21 = vpop.f32.mrf.mxu0 }
  0xc2   : > { %v823_v23 = vpop.f32.mrf.mxu1  ;;  %v2994_v41 = vadd.f32 %v734_v21, %v475_v22 }
  0xc3   : > { %v2964_v24 = vadd.f32 %v823_v23, %v475_v22  ;;  %v525_v48 = vpop.permute.xlu2 %524 }
  0xc9   : > { %v737_v30 = vpop.f32.mrf.mxu0 }
  0xca   : > { %v2980_v32 = vadd.f32 %v737_v30, %v480_v25  ;;  %v826_v33 = vpop.f32.mrf.mxu1 }
  0xcb   : > { %v2982_v34 = vadd.f32 %v826_v33, %v480_v25 }
  0xcc   : > { %v934_v35 = vmin.f32 %v2978_v31, %v2980_v32  ;;  %776 = vmatmul.bf16.gmra.mxu0 %v2547_v29 }
  0xcd   : > { %v971_v36 = vmin.f32 %v2956_v18, %v2982_v34  ;;  %865 = vmatmul.bf16.gmra.mxu1 %v2547_v29 }
  0xd1   : > { %v739_v40 = vpop.f32.mrf.mxu0 }
  0xd2   : > { %v2996_v42 = vadd.f32 %v739_v40, %v485_v39  ;;  %v828_v43 = vpop.f32.mrf.mxu1 }
  0xd3   : > { %v2998_v44 = vadd.f32 %v828_v43, %v485_v39 }
  0xd4   : > { %v935_v45 = vmin.f32 %v2994_v41, %v2996_v42 }
  0xd5   : > { %v972_v46 = vmin.f32 %v2964_v24, %v2998_v44 }
  0xd9   : > { %v742_v50 = vpop.f32.mrf.mxu0 }
  0xda   : > { %v3010_v51 = vadd.f32 %v742_v50, %v490_v47  ;;  %v831_v52 = vpop.f32.mrf.mxu1 }
  0xdb   : > { %v3012_v53 = vadd.f32 %v831_v52, %v490_v47 }
  0xdc   : > { %v936_v54 = vmin.f32 %v934_v35, %v3010_v51  ;;  %781 = vmatmul.bf16.gmra.mxu0 %v2548_v49 }
  0xdd   : > { %v973_v55 = vmin.f32 %v971_v36, %v3012_v53  ;;  %870 = vmatmul.bf16.gmra.mxu1 %v2548_v49 }
  0xe1   : > { %v744_v58 = vpop.f32.mrf.mxu0 }
  0xe2   : > { %v3019_v59 = vadd.f32 %v744_v58, %v495_v57  ;;  %v833_v60 = vpop.f32.mrf.mxu1  ;;  %v2552_v58 = vld [vmem:[%s5049_s1 + $0x70] sm:$0xff] }
  0xe3   : > { %v3021_v61 = vadd.f32 %v833_v60, %v495_v57  ;;  %v530_v57 = vpop.permute.xlu0 %529 }
  0xe4   : > { %v937_v62 = vmin.f32 %v935_v45, %v3019_v59 }
  0xe5   : > { %v974_v63 = vmin.f32 %v972_v46, %v3021_v61 }
  0xe9   : > { %v747_v3 = vpop.f32.mrf.mxu0 }
  0xea   : > { %v3031_v4 = vadd.f32 %v747_v3, %v500_v1  ;;  %v836_v5 = vpop.f32.mrf.mxu1  ;;  %v535_v3 = vpop.permute.xlu1 %534 }
  0xeb   : > { %v3033_v6 = vadd.f32 %v836_v5, %v500_v1 }
  0xec   : > { %v938_v7 = vmin.f32 %v936_v54, %v3031_v4  ;;  %786 = vmatmul.bf16.gmra.mxu0 %v2549_v2 }
  0xed   : > { %5160 = vst [vmem:[#allocation5_spill] sm:$0xff] %v3033_v6  ;;  %v975_v8 = vmin.f32 %v973_v55, %v3033_v6  ;;  %875 = vmatmul.bf16.gmra.mxu1 %v2549_v2 }
  0xf1   : > { %v749_v11 = vpop.f32.mrf.mxu0 }
  0xf2   : > { %v3040_v12 = vadd.f32 %v749_v11, %v505_v10  ;;  %v838_v13 = vpop.f32.mrf.mxu1 }
  0xf3   : > { %v3042_v14 = vadd.f32 %v838_v13, %v505_v10  ;;  %v540_v13 = vpop.permute.xlu2 %539 }
  0xf4   : > { %v939_v15 = vmin.f32 %v937_v62, %v3040_v12 }
  0xf5   : > { %5161 = vst [vmem:[#allocation6_spill] sm:$0xff] %v3042_v14  ;;  %v976_v16 = vmin.f32 %v974_v63, %v3042_v14 }
  0xf9   : > { %v752_v20 = vpop.f32.mrf.mxu0 }
  0xfa   : > { %v3049_v21 = vadd.f32 %v752_v20, %v510_v17  ;;  %v841_v22 = vpop.f32.mrf.mxu1 }
  0xfb   : > { %v3051_v23 = vadd.f32 %v841_v22, %v510_v17 }
  0xfc   : > { %v940_v25 = vmin.f32 %v938_v7, %v3049_v21  ;;  %791 = vmatmul.bf16.gmra.mxu0 %v2550_v19 }
  0xfd   : > { %5162 = vst [vmem:[#allocation7_spill] sm:$0xff] %v3051_v23  ;;  %v977_v26 = vmin.f32 %v975_v8, %v3051_v23  ;;  %880 = vmatmul.bf16.gmra.mxu1 %v2550_v19 }
 0x101   : > { %v754_v28 = vpop.f32.mrf.mxu0 }
 0x102   : > { %v3055_v29 = vadd.f32 %v754_v28, %v515_v27  ;;  %v843_v30 = vpop.f32.mrf.mxu1 }
 0x103   : > { %v3057_v33 = vadd.f32 %v843_v30, %v515_v27 }
 0x104   : > { %v941_v35 = vmin.f32 %v939_v15, %v3055_v29  ;;  %v2553_v15 = vld [vmem:[%s5049_s1 + $0x78] sm:$0xff] }
 0x105   : > { %5163 = vst [vmem:[#allocation8_spill] sm:$0xff] %v3057_v33  ;;  %v978_v36 = vmin.f32 %v976_v16, %v3057_v33 }
 0x109   : > { %v757_v39 = vpop.f32.mrf.mxu0 }
 0x10a   : > { %v3064_v40 = vadd.f32 %v757_v39, %v520_v37  ;;  %v846_v43 = vpop.f32.mrf.mxu1 }
 0x10b   : > { %v3066_v45 = vadd.f32 %v846_v43, %v520_v37 }
 0x10c   : > { %v942_v46 = vmin.f32 %v940_v25, %v3064_v40  ;;  %796 = vmatmul.bf16.gmra.mxu0 %v2551_v38 }
 0x10d   : > { %5164 = vst [vmem:[#allocation9_spill] sm:$0xff] %v3066_v45  ;;  %v979_v47 = vmin.f32 %v977_v26, %v3066_v45  ;;  %885 = vmatmul.bf16.gmra.mxu1 %v2551_v38  ;;  %v545_v26 = vpop.permute.xlu0 %544  ;;  %v550_v38 = vpop.permute.xlu1 %549 }
 0x111   : > { %v759_v49 = vpop.f32.mrf.mxu0 }
 0x112   : > { %v3070_v50 = vadd.f32 %v759_v49, %v525_v48  ;;  %v848_v52 = vpop.f32.mrf.mxu1 }
 0x113   : > { %v3072_v54 = vadd.f32 %v848_v52, %v525_v48  ;;  %v555_v52 = vpop.permute.xlu2 %554 }
 0x114   : > { %v943_v55 = vmin.f32 %v941_v35, %v3070_v50 }
 0x115   : > { %5165 = vst [vmem:[#allocation10_spill] sm:$0xff] %v3072_v54  ;;  %v980_v56 = vmin.f32 %v978_v36, %v3072_v54 }
 0x119   : > { %v762_v60 = vpop.f32.mrf.mxu0 }
 0x11a   : > { %v3079_v62 = vadd.f32 %v762_v60, %v530_v57  ;;  %v851_v63 = vpop.f32.mrf.mxu1 }
 0x11b   : > { %v3081_v0 = vadd.f32 %v851_v63, %v530_v57 }
 0x11c   : > { %v944_v1 = vmin.f32 %v942_v46, %v3079_v62  ;;  %801 = vmatmul.bf16.gmra.mxu0 %v2552_v58 }
 0x11d   : > { %5166 = vst [vmem:[#allocation11_spill] sm:$0xff] %v3081_v0  ;;  %v981_v2 = vmin.f32 %v979_v47, %v3081_v0  ;;  %890 = vmatmul.bf16.gmra.mxu1 %v2552_v58 }
 0x121   : > { %v764_v5 = vpop.f32.mrf.mxu0 }
 0x122   : > { %v3085_v7 = vadd.f32 %v764_v5, %v535_v3  ;;  %v853_v8 = vpop.f32.mrf.mxu1 }
 0x123   : > { %v3087_v9 = vadd.f32 %v853_v8, %v535_v3 }
 0x124   : > { %v945_v10 = vmin.f32 %v943_v55, %v3085_v7 }
 0x125   : > { %5167 = vst [vmem:[#allocation12_spill] sm:$0xff] %v3087_v9  ;;  %v982_v11 = vmin.f32 %v980_v56, %v3087_v9 }
 0x129   : > { %v767_v16 = vpop.f32.mrf.mxu0 }
 0x12a   : > { %v3094_v17 = vadd.f32 %v767_v16, %v540_v13  ;;  %v856_v19 = vpop.f32.mrf.mxu1 }
 0x12b   : > { %v3096_v20 = vadd.f32 %v856_v19, %v540_v13  ;;  %v565_v13 = vpop.permute.xlu1 %564 }
 0x12c   : > { %v946_v22 = vmin.f32 %v944_v1, %v3094_v17  ;;  %806 = vmatmul.bf16.gmra.mxu0 %v2553_v15  ;;  %v560_v1 = vpop.permute.xlu0 %559 }
 0x12d   : > { %5168 = vst [vmem:[#allocation13_spill] sm:$0xff] %v3096_v20  ;;  %v983_v25 = vmin.f32 %v981_v2, %v3096_v20  ;;  %895 = vmatmul.bf16.gmra.mxu1 %v2553_v15 }
 0x131   : > { %v769_v27 = vpop.f32.mrf.mxu0 }
 0x132   : > { %v3100_v28 = vadd.f32 %v769_v27, %v545_v26  ;;  %v858_v30 = vpop.f32.mrf.mxu1  ;;  %v570_v27 = vpop.permute.xlu2 %569 }
 0x133   : > { %v3102_v35 = vadd.f32 %v858_v30, %v545_v26 }
 0x134   : > { %v947_v36 = vmin.f32 %v945_v10, %v3100_v28 }
 0x135   : > { %5169 = vst [vmem:[#allocation14_spill] sm:$0xff] %v3102_v35  ;;  %v984_v37 = vmin.f32 %v982_v11, %v3102_v35 }
 0x139   : > { %v772_v39 = vpop.f32.mrf.mxu0 }
 0x13a   : > { %v3106_v43 = vadd.f32 %v772_v39, %v550_v38  ;;  %v861_v46 = vpop.f32.mrf.mxu1 }
 0x13b   : > { %v3108_v47 = vadd.f32 %v861_v46, %v550_v38 }
 0x13c   : > { %v948_v48 = vmin.f32 %v946_v22, %v3106_v43 }
 0x13d   : > { %5170 = vst [vmem:[#allocation15_spill] sm:$0xff] %v3108_v47  ;;  %v985_v49 = vmin.f32 %v983_v25, %v3108_v47 }
 0x141   : > { %v774_v55 = vpop.f32.mrf.mxu0 }
 0x142   : > { %v3112_v56 = vadd.f32 %v774_v55, %v555_v52  ;;  %v863_v57 = vpop.f32.mrf.mxu1 }
 0x143   : > { %v3114_v58 = vadd.f32 %v863_v57, %v555_v52 }
 0x144   : > { %v949_v60 = vmin.f32 %v947_v36, %v3112_v56 }
 0x145   : > { %5171 = vst [vmem:[#allocation16_spill] sm:$0xff] %v3114_v58  ;;  %v986_v63 = vmin.f32 %v984_v37, %v3114_v58 }
 0x149   : > { %v777_v2 = vpop.f32.mrf.mxu0 }
 0x14a   : > { %v3118_v3 = vadd.f32 %v777_v2, %v560_v1  ;;  %v866_v5 = vpop.f32.mrf.mxu1 }
 0x14b   : > { %v3120_v8 = vadd.f32 %v866_v5, %v560_v1  ;;  %v580_v1 = vpop.permute.xlu1 %579 }
 0x14c   : > { %v950_v10 = vmin.f32 %v948_v48, %v3118_v3  ;;  %v575_v48 = vpop.permute.xlu0 %574 }
 0x14d   : > { %5172 = vst [vmem:[#allocation17_spill] sm:$0xff] %v3120_v8  ;;  %v987_v11 = vmin.f32 %v985_v49, %v3120_v8 }
 0x151   : > { %v779_v15 = vpop.f32.mrf.mxu0 }
 0x152   : > { %v3124_v16 = vadd.f32 %v779_v15, %v565_v13  ;;  %v868_v19 = vpop.f32.mrf.mxu1 }
 0x153   : > { %v3126_v22 = vadd.f32 %v868_v19, %v565_v13 }
 0x154   : > { %v951_v25 = vmin.f32 %v949_v60, %v3124_v16  ;;  %v590_v8 = vpop.permute.xlu0 %589 }
 0x155   : > { %5173 = vst [vmem:[#allocation18_spill] sm:$0xff] %v3126_v22  ;;  %v988_v26 = vmin.f32 %v986_v63, %v3126_v22 }
 0x159   : > { %v782_v30 = vpop.f32.mrf.mxu0 }
 0x15a   : > { %v3130_v36 = vadd.f32 %v782_v30, %v570_v27  ;;  %v871_v37 = vpop.f32.mrf.mxu1 }
 0x15b   : > { %v3132_v38 = vadd.f32 %v871_v37, %v570_v27 }
 0x15c   : > { %v952_v39 = vmin.f32 %v950_v10, %v3130_v36  ;;  %v605_v47 = vpop.permute.xlu0 %604 }
 0x15d   : > { %5174 = vst [vmem:[#allocation19_spill] sm:$0xff] %v3132_v38  ;;  %v989_v46 = vmin.f32 %v987_v11, %v3132_v38  ;;  %v585_v38 = vpop.permute.xlu2 %584 }
 0x161   : > { %v784_v49 = vpop.f32.mrf.mxu0 }
 0x162   : > { %v3136_v52 = vadd.f32 %v784_v49, %v575_v48  ;;  %v873_v55 = vpop.f32.mrf.mxu1 }
 0x163   : > { %v3138_v57 = vadd.f32 %v873_v55, %v575_v48 }
 0x164   : > { %v953_v60 = vmin.f32 %v951_v25, %v3136_v52 }
 0x165   : > { %5175 = vst [vmem:[#allocation20_spill] sm:$0xff] %v3138_v57  ;;  %v990_v63 = vmin.f32 %v988_v26, %v3138_v57 }
 0x169   : > { %v787_v2 = vpop.f32.mrf.mxu0 }
 0x16a   : > { %v3142_v5 = vadd.f32 %v787_v2, %v580_v1  ;;  %v876_v13 = vpop.f32.mrf.mxu1 }
 0x16b   : > { %v3144_v15 = vadd.f32 %v876_v13, %v580_v1  ;;  %v595_v1 = vpop.permute.xlu1 %594 }
 0x16c   : > { %5176 = vst [vmem:[#allocation21_spill] sm:$0xff] %v3142_v5  ;;  %v954_v10 = vmin.f32 %v952_v39, %v3142_v5  ;;  %v600_v39 = vpop.permute.xlu2 %599 }
 0x16d   : > { %5177 = vst [vmem:[#allocation22_spill] sm:$0xff] %v3144_v15  ;;  %v991_v11 = vmin.f32 %v989_v46, %v3144_v15 }
 0x171   : > { %v789_v19 = vpop.f32.mrf.mxu0 }
 0x172   : > { %v878_v27 = vpop.f32.mrf.mxu1  ;;  %v3148_v15 = vadd.f32 %v789_v19, %v585_v38 }
 0x173   : > { %v610_v46 = vpop.permute.xlu1 %609  ;;  %v3150_v35 = vadd.f32 %v878_v27, %v585_v38 }
 0x174   : > { %v955_v23 = vmin.f32 %v953_v60, %v3148_v15  ;;  %v615_v19 = vpop.permute.xlu2 %614  ;;  %v620_v60 = vpop.permute.xlu0 %619 }
 0x175   : > { %5178 = vst [vmem:[#allocation23_spill] sm:$0xff] %v3150_v35  ;;  %v992_v38 = vmin.f32 %v990_v63, %v3150_v35 }
 0x179   : > { %v792_v30 = vpop.f32.mrf.mxu0 }
 0x17a   : > { %v881_v37 = vpop.f32.mrf.mxu1  ;;  %v3152_v9 = vadd.f32 %v792_v30, %v590_v8 }
 0x17b   : > { %v3156_v45 = vadd.f32 %v881_v37, %v590_v8 }
 0x17d   : > { %5179 = vst [vmem:[#allocation24_spill] sm:$0xff] %v3156_v45 }
 0x181   : > { %v794_v48 = vpop.f32.mrf.mxu0 }
 0x182   : > { %v883_v49 = vpop.f32.mrf.mxu1  ;;  %v3154_v0 = vadd.f32 %v794_v48, %v595_v1  ;;  %v956_v48 = vmin.f32 %v954_v10, %v3152_v9 }
 0x183   : > { %v3158_v33 = vadd.f32 %v883_v49, %v595_v1 }
 0x184   : > { %v957_v8 = vmin.f32 %v955_v23, %v3154_v0  ;;  %v625_v23 = vpop.permute.xlu1 %624 }
 0x185   : > { %5180 = vst [vmem:[#allocation25_spill] sm:$0xff] %v3158_v33 }
 0x189   : > { %v797_v25 = vpop.f32.mrf.mxu0 }
 0x18a   : > { %v886_v55 = vpop.f32.mrf.mxu1  ;;  %v3161_v14 = vadd.f32 %v797_v25, %v600_v39  ;;  %v993_v25 = vmin.f32 %v991_v11, %v3156_v45 }
 0x18b   : > { %v3166_v27 = vadd.f32 %v886_v55, %v600_v39 }
 0x18d   : > { %5182 = vst [vmem:[#allocation27_spill] sm:$0xff] %v3166_v27  ;;  %v995_v55 = vmin.f32 %v993_v25, %v3166_v27 }
 0x191   : > { %v799_v26 = vpop.f32.mrf.mxu0 }
 0x192   : > { %v888_v57 = vpop.f32.mrf.mxu1  ;;  %v3163_v6 = vadd.f32 %v799_v26, %v605_v47  ;;  %v994_v26 = vmin.f32 %v992_v38, %v3158_v33 }
 0x193   : > { %v3168_v30 = vadd.f32 %v888_v57, %v605_v47  ;;  %v958_v47 = vmin.f32 %v956_v48, %v3161_v14 }
 0x194   : > { %5181 = vst [vmem:[#allocation26_spill] sm:$0xff] %v3163_v6  ;;  %v959_v57 = vmin.f32 %v957_v8, %v3163_v6 }
 0x195   : > { %5183 = vst [vmem:[#allocation28_spill] sm:$0xff] %v3168_v30 }
 0x199   : > { %v802_v2 = vpop.f32.mrf.mxu0 }
 0x19a   : > { %v891_v22 = vpop.f32.mrf.mxu1  ;;  %v3172_v37 = vadd.f32 %v802_v2, %v610_v46  ;;  %v996_v2 = vmin.f32 %v994_v26, %v3168_v30 }
 0x19b   : > { %v3178_v1 = vadd.f32 %v891_v22, %v610_v46 }
 0x19c   : > { %5184 = vst [vmem:[#allocation29_spill] sm:$0xff] %v3172_v37  ;;  %v960_v39 = vmin.f32 %v958_v47, %v3172_v37 }
 0x19d   : > { %5186 = vst [vmem:[#allocation31_spill] sm:$0xff] %v3178_v1 }
 0x1a1   : > { %v804_v13 = vpop.f32.mrf.mxu0 }
 0x1a2   : > { %v893_v58 = vpop.f32.mrf.mxu1  ;;  %v3174_v49 = vadd.f32 %v804_v13, %v615_v19 }
 0x1a3   : > { %v3180_v63 = vadd.f32 %v893_v58, %v615_v19  ;;  %v997_v19 = vmin.f32 %v995_v55, %v3178_v1 }
 0x1a4   : > { %5185 = vst [vmem:[#allocation30_spill] sm:$0xff] %v3174_v49  ;;  %v961_v22 = vmin.f32 %v959_v57, %v3174_v49 }
 0x1a5   : > { %5187 = vst [vmem:[#allocation32_spill] sm:$0xff] %v3180_v63 }
 0x1a9   : > { %v807_v20 = vpop.f32.mrf.mxu0 }
 0x1aa   : > { %v896_v54 = vpop.f32.mrf.mxu1  ;;  %v3184_v10 = vadd.f32 %v807_v20, %v620_v60  ;;  %v998_v20 = vmin.f32 %v996_v2, %v3180_v63 }
 0x1ab   : > { %v3188_v13 = vadd.f32 %v896_v54, %v620_v60 }
 0x1ac   : > { %5188 = vst [vmem:[#allocation33_spill] sm:$0xff] %v3184_v10  ;;  %v962_v48 = vmin.f32 %v960_v39, %v3184_v10 }
 0x1ad   : > { %5189 = vst [vmem:[#allocation34_spill] sm:$0xff] %v3188_v13  ;;  %v999_v54 = vmin.f32 %v997_v19, %v3188_v13 }
 0x1b1   : > { %v809_v11 = vpop.f32.mrf.mxu0 }
 0x1b2   : > { %v3192_v58 = vadd.f32 %v809_v11, %v625_v23  ;;  %v898_v46 = vpop.f32.mrf.mxu1  ;;  %v5093_v11 = vlaneseq }
 0x1b3   : > { %v3196_v38 = vadd.f32 %v898_v46, %v625_v23 }
 0x1b4   : > { %5190 = vst [vmem:[#allocation35_spill] sm:$0xff] %v3192_v58  ;;  %v963_v8 = vmin.f32 %v961_v22, %v3192_v58  ;;  %v3203_v2 = vshrl.u32 %v5093_v11, 7 }
 0x1b5   : > { %5191 = vst [vmem:[#allocation36_spill] sm:$0xff] %v3196_v38  ;;  %v1000_v60 = vmin.f32 %v998_v20, %v3196_v38 }
 0x1b6   : > { %v964_v25 = vmin.f32 %v962_v48, %v963_v8  ;;  %v3206_v22 = vadd.s32 8, %v3203_v2  ;;  %v3211_v20 = vadd.s32 16, %v3203_v2  ;;  %v3214_v48 = vadd.s32 24, %v3203_v2 }
 0x1b7   : > { %v1001_v26 = vmin.f32 %v999_v54, %v1000_v60  ;;  %v3217_v8 = vadd.s32 32, %v3203_v2  ;;  %v3272_v60 = vadd.s32 56, %v3203_v2  ;;  %v3299_v11 = vadd.s32 128, %v3203_v2 }
 0x1b8   : > { %v965_v47 = vrot.slane %v964_v25, 4  ;;  %5192 = vst [vmem:[#allocation37_spill] sm:$0xff] %v3206_v22  ;;  %v3302_v13 = vadd.s32 136, %v3203_v2  ;;  %v3305_v63 = vadd.s32 144, %v3203_v2  ;;  %v3308_v1 = vadd.s32 152, %v3203_v2 }
 0x1b9   : > { %v1002_v57 = vrot.slane %v1001_v26, 4  ;;  %5193 = vst [vmem:[#allocation38_spill] sm:$0xff] %v3211_v20  ;;  %v3311_v33 = vadd.s32 160, %v3203_v2  ;;  %v3314_v45 = vadd.s32 168, %v3203_v2  ;;  %v3317_v35 = vadd.s32 176, %v3203_v2 }
 0x1ba   : > { %v966_v30 = vmin.f32 %v964_v25, %v965_v47  ;;  %v3275_v25 = vadd.s32 64, %v3203_v2  ;;  %v3281_v47 = vadd.s32 80, %v3203_v2  ;;  %v3320_v58 = vadd.s32 184, %v3203_v2 }
 0x1bb   : > { %v1003_v27 = vmin.f32 %v1001_v26, %v1002_v57  ;;  %v3278_v26 = vadd.s32 72, %v3203_v2  ;;  %v3284_v57 = vadd.s32 88, %v3203_v2  ;;  %v3323_v10 = vadd.s32 192, %v3203_v2 }
 0x1bc   : > { %v967_v55 = vrot.slane %v966_v30, 2  ;;  %5197 = vst [vmem:[#allocation42_spill] sm:$0xff] %v3320_v58  ;;  %v3326_v49 = vadd.s32 200, %v3203_v2  ;;  %v3329_v37 = vadd.s32 208, %v3203_v2  ;;  %v3335_v6 = vadd.s32 224, %v3203_v2 }
 0x1bd   : > { %v1004_v46 = vrot.slane %v1003_v27, 2  ;;  %5198 = vst [vmem:[#allocation43_spill] sm:$0xff] %v3323_v10 }
 0x1be   : > { %v968_v23 = vmin.f32 %v966_v30, %v967_v55  ;;  %v3269_v30 = vadd.s32 48, %v3203_v2  ;;  %v3287_v55 = vadd.s32 96, %v3203_v2  ;;  %5199 = vst [vmem:[#allocation44_spill] sm:$0xff] %v3326_v49 }
 0x1bf   : > { %v1005_v54 = vmin.f32 %v1003_v27, %v1004_v46  ;;  %v3260_v27 = vadd.s32 40, %v3203_v2  ;;  %v3293_v46 = vadd.s32 112, %v3203_v2  ;;  %5200 = vst [vmem:[#allocation45_spill] sm:$0xff] %v3329_v37 }
 0x1c0   : > { %v969_v39 = vrot.slane %v968_v23, 1  ;;  %5194 = vst [vmem:[#allocation39_spill] sm:$0xff] %v3287_v55 }
 0x1c1   : > { %5196 = vst [vmem:[#allocation41_spill] sm:$0xff] %v3293_v46  ;;  %v1006_v38 = vrot.slane %v1005_v54, 1 }
 0x1c2   : > { %v3208_v19 = vmin.f32 %v968_v23, %v969_v39  ;;  %v3290_v23 = vadd.s32 104, %v3203_v2  ;;  %v3296_v39 = vadd.s32 120, %v3203_v2  ;;  %5201 = vst [vmem:[#allocation46_spill] sm:$0xff] %v3335_v6 }
 0x1c3   : > { %v3349_v49 = vmin.f32 %v1005_v54, %v1006_v38  ;;  %v5207_v38 = vld [vmem:[#allocation5_spill] sm:$0xff] }
 0x1c4   : > { %vm1008_vm0 = vcmp.eq.f32.partialorder %v2978_v31, %v3208_v19  ;;  %vm1010_vm1 = vcmp.eq.f32.partialorder %v2994_v41, %v3208_v19  ;;  %vm1012_vm2 = vcmp.eq.f32.partialorder %v2980_v32, %v3208_v19  ;;  %vm1014_vm3 = vcmp.eq.f32.partialorder %v2996_v42, %v3208_v19  ;;  %5195 = vst [vmem:[#allocation40_spill] sm:$0xff] %v3290_v23 }
 0x1c5   : > { %vm1016_vm4 = vcmp.eq.f32.partialorder %v3010_v51, %v3208_v19  ;;  %vm1018_vm5 = vcmp.eq.f32.partialorder %v3019_v59, %v3208_v19  ;;  %vm1020_vm6 = vcmp.eq.f32.partialorder %v3031_v4, %v3208_v19  ;;  %vm1022_vm7 = vcmp.eq.f32.partialorder %v3040_v12, %v3208_v19 }
 0x1c6   : > { %vm1024_vm8 = vcmp.eq.f32.partialorder %v3049_v21, %v3208_v19  ;;  %vm1034_vm13 = vcmp.eq.f32.partialorder %v3085_v7, %v3208_v19  ;;  %vm1042_vm10 = vcmp.eq.f32.partialorder %v3112_v56, %v3208_v19  ;;  %vm1044_vm11 = vcmp.eq.f32.partialorder %v3118_v3, %v3208_v19 }
 0x1c7   : > { %vm1046_vm12 = vcmp.eq.f32.partialorder %v3124_v16, %v3208_v19  ;;  %vm1048_vm14 = vcmp.eq.f32.partialorder %v3130_v36, %v3208_v19  ;;  %vm1050_vm15 = vcmp.eq.f32.partialorder %v3136_v52, %v3208_v19  ;;  %vm1052_vm9 = vcmp.eq.f32.partialorder %v3142_v5, %v3208_v19 }
 0x1c8   : > { %v3332_v5 = vadd.s32 216, %v3203_v2  ;;  %v1072_v58 = vsel %vm1008_vm0, %v3203_v2, 256  ;;  %v1074_v10 = vsel %vm1010_vm1, %v3206_v22, 256  ;;  %v1076_v37 = vsel %vm1012_vm2, %v3211_v20, 256 }
 0x1c9   : > { %v1078_v6 = vsel %vm1014_vm3, %v3214_v48, 256  ;;  %v1080_v31 = vsel %vm1016_vm4, %v3217_v8, 256  ;;  %v1082_v41 = vsel %vm1018_vm5, %v3260_v27, 256  ;;  %v1084_v32 = vsel %vm1020_vm6, %v3269_v30, 256 }
 0x1ca   : > { %v1086_v42 = vsel %vm1022_vm7, %v3272_v60, 256  ;;  %v1088_v51 = vsel %vm1024_vm8, %v3275_v25, 256  ;;  %vm5202_vm0 = vcmp.eq.f32.partialorder %v3055_v29, %v3208_v19  ;;  %vm5203_vm1 = vcmp.eq.f32.partialorder %v3064_v40, %v3208_v19 }
 0x1cb   : > { %v1090_v59 = vsel %vm5202_vm0, %v3278_v26, 256  ;;  %v1092_v4 = vsel %vm5203_vm1, %v3281_v47, 256  ;;  %vm5204_vm2 = vcmp.eq.f32.partialorder %v3070_v50, %v3208_v19  ;;  %vm5205_vm3 = vcmp.eq.f32.partialorder %v3079_v62, %v3208_v19 }
 0x1cc   : > { %v1094_v12 = vsel %vm5204_vm2, %v3284_v57, 256  ;;  %v1096_v21 = vsel %vm5205_vm3, %v3287_v55, 256  ;;  %v1098_v29 = vsel %vm1034_vm13, %v3290_v23, 256  ;;  %vm5206_vm4 = vcmp.eq.f32.partialorder %v3094_v17, %v3208_v19  ;;  %v5215_v55 = vld [vmem:[#allocation13_spill] sm:$0xff] }
 0x1cd   : > { %v1100_v40 = vsel %vm5206_vm4, %v3293_v46, 256  ;;  %vm1136_vm5 = vcmp.lt.s32.totalorder %v1072_v58, %v1076_v37  ;;  %vm1138_vm6 = vcmp.lt.s32.totalorder %v1074_v10, %v1078_v6  ;;  %v5211_v46 = vld [vmem:[#allocation9_spill] sm:$0xff]  ;;  %vm5223_vm13 = vcmp.eq.f32.partialorder %v3100_v28, %v3208_v19 }
 0x1ce   : > { %v1137_v50 = vsel %vm1136_vm5, %v1072_v58, %v1076_v37  ;;  %v1139_v62 = vsel %vm1138_vm6, %v1074_v10, %v1078_v6  ;;  %v5208_v6 = vld [vmem:[#allocation6_spill] sm:$0xff]  ;;  %v5209_v37 = vld [vmem:[#allocation7_spill] sm:$0xff]  ;;  %v5210_v10 = vld [vmem:[#allocation8_spill] sm:$0xff]  ;;  %vm5225_vm6 = vcmp.eq.f32.partialorder %v3106_v43, %v3208_v19  ;;  %v1106_v28 = vsel %vm1042_vm10, %v3302_v13, 256 }
 0x1cf   : > { %vm1140_vm1 = vcmp.lt.s32.totalorder %v1137_v50, %v1080_v31  ;;  %vm1142_vm2 = vcmp.lt.s32.totalorder %v1139_v62, %v1082_v41  ;;  %v1108_v43 = vsel %vm1044_vm11, %v3305_v63, 256  ;;  %v1110_v56 = vsel %vm1046_vm12, %v3308_v1, 256 }
 0x1d0   : > { %v1141_v7 = vsel %vm1140_vm1, %v1137_v50, %v1080_v31  ;;  %v1143_v17 = vsel %vm1142_vm2, %v1139_v62, %v1082_v41  ;;  %v5212_v31 = vld [vmem:[#allocation10_spill] sm:$0xff]  ;;  %v5219_v50 = vld [vmem:[#allocation17_spill] sm:$0xff]  ;;  %vm1056_vm10 = vcmp.eq.f32.partialorder %v3152_v9, %v3208_v19  ;;  %v1112_v3 = vsel %vm1048_vm14, %v3311_v33, 256 }
 0x1d1   : > { %vm1144_vm0 = vcmp.lt.s32.totalorder %v1141_v7, %v1084_v32  ;;  %vm1146_vm8 = vcmp.lt.s32.totalorder %v1143_v17, %v1086_v42  ;;  %v1114_v16 = vsel %vm1050_vm15, %v3314_v45, 256  ;;  %vm1060_vm11 = vcmp.eq.f32.partialorder %v3161_v14, %v3208_v19 }
 0x1d2   : > { %v1145_v58 = vsel %vm1144_vm0, %v1141_v7, %v1084_v32  ;;  %v1147_v54 = vsel %vm1146_vm8, %v1143_v17, %v1086_v42  ;;  %v5216_v32 = vld [vmem:[#allocation14_spill] sm:$0xff]  ;;  %v5217_v42 = vld [vmem:[#allocation15_spill] sm:$0xff]  ;;  %v5218_v7 = vld [vmem:[#allocation16_spill] sm:$0xff]  ;;  %v1116_v36 = vsel %vm1052_vm9, %v3317_v35, 256 }
 0x1d3   : > { %vm1148_vm5 = vcmp.lt.s32.totalorder %v1145_v58, %v1088_v51  ;;  %vm1150_vm4 = vcmp.lt.s32.totalorder %v1147_v54, %v1090_v59  ;;  %vm1041_vm2 = vcmp.eq.f32.partialorder %v5217_v42, %v3349_v49 }
 0x1d4   : > { %v1149_v62 = vsel %vm1148_vm5, %v1145_v58, %v1088_v51  ;;  %v1151_v23 = vsel %vm1150_vm4, %v1147_v54, %v1090_v59  ;;  %vm1045_vm5 = vcmp.eq.f32.partialorder %v5219_v50, %v3349_v49  ;;  %v5220_v51 = vld [vmem:[#allocation18_spill] sm:$0xff]  ;;  %v5221_v59 = vld [vmem:[#allocation19_spill] sm:$0xff]  ;;  %v1104_v58 = vsel %vm5225_vm6, %v3299_v11, 256  ;;  %v5266_v50 = vld [vmem:[#allocation32_spill] sm:$0xff] }
 0x1d5   : > { %vm1152_vm1 = vcmp.lt.s32.totalorder %v1149_v62, %v1092_v4  ;;  %vm1154_vm7 = vcmp.lt.s32.totalorder %v1151_v23, %v1094_v12  ;;  %vm1047_vm4 = vcmp.eq.f32.partialorder %v5220_v51, %v3349_v49  ;;  %v5224_v54 = vld [vmem:[#allocation22_spill] sm:$0xff]  ;;  %v3453_v51 = vadd.s32 240, %v3203_v2 }
 0x1d6   : > { %v1153_v17 = vsel %vm1152_vm1, %v1149_v62, %v1092_v4  ;;  %v1155_v41 = vsel %vm1154_vm7, %v1151_v23, %v1094_v12  ;;  %v1102_v4 = vsel %vm5223_vm13, %v3296_v39, 256  ;;  %vm1053_vm7 = vcmp.eq.f32.partialorder %v5224_v54, %v3349_v49 }
 0x1d7   : > { %vm1156_vm0 = vcmp.lt.s32.totalorder %v1153_v17, %v1096_v21  ;;  %vm1158_vm3 = vcmp.lt.s32.totalorder %v1155_v41, %v1098_v29  ;;  %v3450_v62 = vadd.s32 232, %v3203_v2  ;;  %vm1054_vm13 = vcmp.eq.f32.partialorder %v3148_v15, %v3208_v19 }
 0x1d8   : > { %v1157_v23 = vsel %vm1156_vm0, %v1153_v17, %v1096_v21  ;;  %v1159_v12 = vsel %vm1158_vm3, %v1155_v41, %v1098_v29  ;;  %v3464_v41 = vadd.s32 248, %v3203_v2  ;;  %vm1058_vm6 = vcmp.eq.f32.partialorder %v3154_v0, %v3208_v19 }
 0x1d9   : > { %vm1160_vm1 = vcmp.lt.s32.totalorder %v1157_v23, %v1100_v40  ;;  %vm1162_vm8 = vcmp.lt.s32.totalorder %v1159_v12, %v1102_v4  ;;  %v1109_v42 = vsel %vm1045_vm5, %v3305_v63, 256 }
 0x1da   : > { %v1161_v21 = vsel %vm1160_vm1, %v1157_v23, %v1100_v40  ;;  %v1163_v29 = vsel %vm1162_vm8, %v1159_v12, %v1102_v4  ;;  %v5226_v23 = vld [vmem:[#allocation26_spill] sm:$0xff]  ;;  %v5232_v12 = vld [vmem:[#allocation44_spill] sm:$0xff] }
 0x1db   : > { %vm1164_vm3 = vcmp.lt.s32.totalorder %v1161_v21, %v1104_v58  ;;  %vm1166_vm0 = vcmp.lt.s32.totalorder %v1163_v29, %v1106_v28  ;;  %vm1062_vm12 = vcmp.eq.f32.partialorder %v5226_v23, %v3208_v19  ;;  %v1122_v15 = vsel %vm1058_vm6, %v5232_v12, 256 }
 0x1dc   : > { %v1165_v40 = vsel %vm1164_vm3, %v1161_v21, %v1104_v58  ;;  %v1167_v17 = vsel %vm1166_vm0, %v1163_v29, %v1106_v28  ;;  %v5228_v28 = vld [vmem:[#allocation42_spill] sm:$0xff]  ;;  %v1126_v0 = vsel %vm1062_vm12, %v3332_v5, 256 }
 0x1dd   : > { %vm1168_vm8 = vcmp.lt.s32.totalorder %v1165_v40, %v1108_v43  ;;  %vm1170_vm1 = vcmp.lt.s32.totalorder %v1167_v17, %v1110_v56  ;;  %v1118_v52 = vsel %vm1054_vm13, %v5228_v28, 256  ;;  %v5235_v28 = vld [vmem:[#allocation45_spill] sm:$0xff] }
 0x1de   : > { %v1169_v58 = vsel %vm1168_vm8, %v1165_v40, %v1108_v43  ;;  %v1171_v4 = vsel %vm1170_vm1, %v1167_v17, %v1110_v56  ;;  %v5229_v43 = vld [vmem:[#allocation29_spill] sm:$0xff]  ;;  %v5230_v56 = vld [vmem:[#allocation30_spill] sm:$0xff]  ;;  %v5231_v40 = vld [vmem:[#allocation43_spill] sm:$0xff]  ;;  %v1124_v9 = vsel %vm1060_vm11, %v5235_v28, 256 }
 0x1df   : > { %vm1172_vm3 = vcmp.lt.s32.totalorder %v1169_v58, %v1112_v3  ;;  %vm1174_vm0 = vcmp.lt.s32.totalorder %v1171_v4, %v1114_v16  ;;  %vm1064_vm14 = vcmp.eq.f32.partialorder %v5229_v43, %v3208_v19  ;;  %vm1066_vm15 = vcmp.eq.f32.partialorder %v5230_v56, %v3208_v19 }
 0x1e0   : > { %v1173_v21 = vsel %vm1172_vm3, %v1169_v58, %v1112_v3  ;;  %v1175_v29 = vsel %vm1174_vm0, %v1171_v4, %v1114_v16  ;;  %v1120_v17 = vsel %vm1056_vm10, %v5231_v40, 256  ;;  %v5233_v58 = vld [vmem:[#allocation33_spill] sm:$0xff]  ;;  %v5234_v4 = vld [vmem:[#allocation35_spill] sm:$0xff]  ;;  %v1130_v14 = vsel %vm1066_vm15, %v3450_v62, 256 }
 0x1e1   : > { %vm1176_vm8 = vcmp.lt.s32.totalorder %v1173_v21, %v1116_v36  ;;  %vm1178_vm1 = vcmp.lt.s32.totalorder %v1175_v29, %v1118_v52  ;;  %vm1068_vm9 = vcmp.eq.f32.partialorder %v5233_v58, %v3208_v19  ;;  %vm1070_vm13 = vcmp.eq.f32.partialorder %v5234_v4, %v3208_v19 }
 0x1e2   : > { %v1177_v3 = vsel %vm1176_vm8, %v1173_v21, %v1116_v36  ;;  %v1179_v16 = vsel %vm1178_vm1, %v1175_v29, %v1118_v52  ;;  %v5236_v21 = vld [vmem:[#allocation46_spill] sm:$0xff]  ;;  %v1132_v28 = vsel %vm1068_vm9, %v3453_v51, 256  ;;  %v1134_v23 = vsel %vm1070_vm13, %v3464_v41, 256 }
 0x1e3   : > { %vm1180_vm3 = vcmp.lt.s32.totalorder %v1177_v3, %v1120_v17  ;;  %vm1182_vm0 = vcmp.lt.s32.totalorder %v1179_v16, %v1122_v15  ;;  %v1128_v29 = vsel %vm1064_vm14, %v5236_v21, 256  ;;  %vm5237_vm8 = vcmp.eq.f32.partialorder %v2956_v18, %v3349_v49 }
 0x1e4   : > { %v1181_v36 = vsel %vm1180_vm3, %v1177_v3, %v1120_v17  ;;  %v1183_v52 = vsel %vm1182_vm0, %v1179_v16, %v1122_v15  ;;  %v1073_v43 = vsel %vm5237_vm8, %v3203_v2, 256  ;;  %vm5238_vm14 = vcmp.eq.f32.partialorder %v2964_v24, %v3349_v49 }
 0x1e5   : > { %vm1184_vm10 = vcmp.lt.s32.totalorder %v1181_v36, %v1124_v9  ;;  %vm1186_vm6 = vcmp.lt.s32.totalorder %v1183_v52, %v1126_v0  ;;  %v1075_v19 = vsel %vm5238_vm14, %v3206_v22, 256  ;;  %vm5239_vm9 = vcmp.eq.f32.partialorder %v2982_v34, %v3349_v49 }
 0x1e6   : > { %v1185_v58 = vsel %vm1184_vm10, %v1181_v36, %v1124_v9  ;;  %v1187_v4 = vsel %vm1186_vm6, %v1183_v52, %v1126_v0  ;;  %v1077_v56 = vsel %vm5239_vm9, %v3211_v20, 256  ;;  %vm5240_vm13 = vcmp.eq.f32.partialorder %v2998_v44, %v3349_v49 }
 0x1e7   : > { %vm1188_vm11 = vcmp.lt.s32.totalorder %v1185_v58, %v1128_v29  ;;  %vm1190_vm12 = vcmp.lt.s32.totalorder %v1187_v4, %v1130_v14  ;;  %v1079_v3 = vsel %vm5240_vm13, %v3214_v48, 256  ;;  %vm5241_vm0 = vcmp.eq.f32.partialorder %v3012_v53, %v3349_v49 }
 0x1e8   : > { %v1189_v17 = vsel %vm1188_vm11, %v1185_v58, %v1128_v29  ;;  %v1191_v15 = vsel %vm1190_vm12, %v1187_v4, %v1130_v14  ;;  %v1081_v24 = vsel %vm5241_vm0, %v3217_v8, 256  ;;  %vm5242_vm10 = vcmp.eq.f32.partialorder %v3021_v61, %v3349_v49  ;;  %v5249_v58 = vld [vmem:[#allocation39_spill] sm:$0xff] }
 0x1e9   : > { %vm1192_vm15 = vcmp.lt.s32.totalorder %v1189_v17, %v1132_v28  ;;  %vm1194_vm1 = vcmp.lt.s32.totalorder %v1191_v15, %v1134_v23  ;;  %v1083_v9 = vsel %vm5242_vm10, %v3260_v27, 256  ;;  %vm5243_vm6 = vcmp.eq.f32.partialorder %v5207_v38, %v3349_v49  ;;  %v5250_v4 = vld [vmem:[#allocation11_spill] sm:$0xff] }
 0x1ea   : > { %v1193_v16 = vsel %vm1192_vm15, %v1189_v17, %v1132_v28  ;;  %v1195_v18 = vsel %vm1194_vm1, %v1191_v15, %v1134_v23  ;;  %v1085_v44 = vsel %vm5243_vm6, %v3269_v30, 256  ;;  %vm1207_vm11 = vcmp.lt.s32.totalorder %v1073_v43, %v1077_v56 }
 0x1eb   : > { %vm1196_vm3 = vcmp.lt.s32.totalorder %v1193_v16, %v1195_v18  ;;  %vm1209_vm12 = vcmp.lt.s32.totalorder %v1075_v19, %v1079_v3  ;;  %vm5244_vm8 = vcmp.eq.f32.partialorder %v5208_v6, %v3349_v49  ;;  %v1208_v0 = vsel %vm1207_vm11, %v1073_v43, %v1077_v56  ;;  %v5253_v43 = vld [vmem:[#allocation12_spill] sm:$0xff]  ;;  %v5255_v56 = vld [vmem:[#allocation41_spill] sm:$0xff] }
 0x1ec   : > { %v1197_v34 = vsel %vm1196_vm3, %v1193_v16, %v1195_v18  ;;  %v1087_v53 = vsel %vm5244_vm8, %v3272_v60, 256  ;;  %v1210_v36 = vsel %vm1209_vm12, %v1075_v19, %v1079_v3  ;;  %vm5245_vm14 = vcmp.eq.f32.partialorder %v5209_v37, %v3349_v49  ;;  %v5257_v3 = vld [vmem:[#allocation23_spill] sm:$0xff] }
 0x1ed   : > { %v1198_v28 = vrot.slane %v1197_v34, 4  ;;  %v1089_v61 = vsel %vm5245_vm14, %v3275_v25, 256  ;;  %vm5246_vm15 = vcmp.eq.f32.partialorder %v5210_v10, %v3349_v49  ;;  %vm1211_vm1 = vcmp.lt.s32.totalorder %v1208_v0, %v1081_v24 }
 0x1ee   : > { %v1091_v38 = vsel %vm5246_vm15, %v3278_v26, 256  ;;  %vm1213_vm9 = vcmp.lt.s32.totalorder %v1210_v36, %v1083_v9  ;;  %vm5247_vm3 = vcmp.eq.f32.partialorder %v5211_v46, %v3349_v49  ;;  %v1212_v52 = vsel %vm1211_vm1, %v1208_v0, %v1081_v24  ;;  %v5252_v46 = vld [vmem:[#allocation40_spill] sm:$0xff] }
 0x1ef   : > { %vm1199_vm13 = vcmp.lt.s32.totalorder %v1197_v34, %v1198_v28  ;;  %v1093_v6 = vsel %vm5247_vm3, %v3281_v47, 256  ;;  %v1214_v29 = vsel %vm1213_vm9, %v1210_v36, %v1083_v9  ;;  %vm5248_vm0 = vcmp.eq.f32.partialorder %v5212_v31, %v3349_v49  ;;  %v5262_v36 = vld [vmem:[#allocation27_spill] sm:$0xff] }
 0x1f0   : > { %v1200_v14 = vsel %vm1199_vm13, %v1197_v34, %v1198_v28  ;;  %v1095_v37 = vsel %vm5248_vm0, %v3284_v57, 256  ;;  %vm1215_vm10 = vcmp.lt.s32.totalorder %v1212_v52, %v1085_v44  ;;  %vm1217_vm6 = vcmp.lt.s32.totalorder %v1214_v29, %v1087_v53  ;;  %v5259_v34 = vld [vmem:[#allocation24_spill] sm:$0xff]  ;;  %v5260_v28 = vld [vmem:[#allocation25_spill] sm:$0xff] }
 0x1f1   : > { %v1201_v10 = vrot.slane %v1200_v14, 2  ;;  %vm5251_vm11 = vcmp.eq.f32.partialorder %v5250_v4, %v3349_v49  ;;  %v1216_v17 = vsel %vm1215_vm10, %v1212_v52, %v1085_v44  ;;  %v1218_v15 = vsel %vm1217_vm6, %v1214_v29, %v1087_v53  ;;  %v5267_v4 = vld [vmem:[#allocation34_spill] sm:$0xff] }
 0x1f2   : > { %v1097_v23 = vsel %vm5251_vm11, %v5249_v58, 256  ;;  %vm5254_vm12 = vcmp.eq.f32.partialorder %v5253_v43, %v3349_v49  ;;  %vm5256_vm8 = vcmp.eq.f32.partialorder %v5215_v55, %v3349_v49  ;;  %vm1219_vm14 = vcmp.lt.s32.totalorder %v1216_v17, %v1089_v61 }
 0x1f3   : > { %v1099_v19 = vsel %vm5254_vm12, %v5252_v46, 256  ;;  %v1101_v31 = vsel %vm5256_vm8, %v5255_v56, 256  ;;  %vm1221_vm15 = vcmp.lt.s32.totalorder %v1218_v15, %v1091_v38  ;;  %vm1202_vm1 = vcmp.lt.s32.totalorder %v1200_v14, %v1201_v10 }
 0x1f4   : > { %vm1055_vm9 = vcmp.eq.f32.partialorder %v5257_v3, %v3349_v49  ;;  %vm5258_vm13 = vcmp.eq.f32.partialorder %v5216_v32, %v3349_v49  ;;  %v1220_v18 = vsel %vm1219_vm14, %v1216_v17, %v1089_v61  ;;  %v1222_v24 = vsel %vm1221_vm15, %v1218_v15, %v1091_v38  ;;  %v5275_v3 = vld [vmem:[#allocation45_spill] sm:$0xff] }
 0x1f5   : > { %v1103_v16 = vsel %vm5258_vm13, %v3296_v39, 256  ;;  %v1203_v9 = vsel %vm1202_vm1, %v1200_v14, %v1201_v10  ;;  %vm1057_vm3 = vcmp.eq.f32.partialorder %v5259_v34, %v3349_v49  ;;  %v1105_v55 = vsel %vm1041_vm2, %v3299_v11, 256  ;;  %v5265_v14 = vld [vmem:[#allocation31_spill] sm:$0xff] }
 0x1f6   : > { %vm1223_vm0 = vcmp.lt.s32.totalorder %v1220_v18, %v1093_v6  ;;  %vm1225_vm10 = vcmp.lt.s32.totalorder %v1222_v24, %v1095_v37  ;;  %v1204_v44 = vrot.slane %v1203_v9, 1  ;;  %vm1059_vm6 = vcmp.eq.f32.partialorder %v5260_v28, %v3349_v49 }
 0x1f7   : > { %vm5261_vm11 = vcmp.eq.f32.partialorder %v5218_v7, %v3349_v49  ;;  %v1224_v53 = vsel %vm1223_vm0, %v1220_v18, %v1093_v6  ;;  %v1226_v0 = vsel %vm1225_vm10, %v1222_v24, %v1095_v37  ;;  %vm1061_vm12 = vcmp.eq.f32.partialorder %v5262_v36, %v3349_v49  ;;  %v5264_v7 = vld [vmem:[#allocation28_spill] sm:$0xff] }
 0x1f8   : > { %v1107_v32 = vsel %vm5261_vm11, %v3302_v13, 256  ;;  %v1111_v38 = vsel %vm1047_vm4, %v3308_v1, 256  ;;  %vm1227_vm2 = vcmp.lt.s32.totalorder %v1224_v53, %v1097_v23  ;;  %vm1229_vm8 = vcmp.lt.s32.totalorder %v1226_v0, %v1099_v19  ;;  %v5272_v24 = vld [vmem:[#allocation20_spill] sm:$0xff] }
 0x1f9   : > { %vm1205_vm14 = vcmp.lt.s32.totalorder %v1203_v9, %v1204_v44  ;;  %vm1063_vm15 = vcmp.eq.f32.partialorder %v5264_v7, %v3349_v49  ;;  %v1228_v6 = vsel %vm1227_vm2, %v1224_v53, %v1097_v23  ;;  %v1230_v52 = vsel %vm1229_vm8, %v1226_v0, %v1099_v19  ;;  %v5274_v53 = vld [vmem:[#allocation42_spill] sm:$0xff] }
 0x1fa   : > { %v3624_v29 = vsel %vm1205_vm14, %v1203_v9, %v1204_v44  ;;  %vm1065_vm1 = vcmp.eq.f32.partialorder %v5265_v14, %v3349_v49  ;;  %vm1231_vm13 = vcmp.lt.s32.totalorder %v1228_v6, %v1101_v31  ;;  %vm1233_vm5 = vcmp.lt.s32.totalorder %v1230_v52, %v1103_v16 }
 0x1fb   : > { %v1232_v37 = vsel %vm1231_vm13, %v1228_v6, %v1101_v31  ;;  %v1234_v10 = vsel %vm1233_vm5, %v1230_v52, %v1103_v16  ;;  %vm1308_vm4 = vcmp.eq.s32.totalorder %v3296_v39, %v3624_v29  ;;  %vm1340_vm10 = vcmp.eq.s32.totalorder %v3464_v41, %v3624_v29  ;;  %v5270_v16 = vld [vmem:[#allocation36_spill] sm:$0xff] }
 0x1fc   : > { %vm1235_vm2 = vcmp.lt.s32.totalorder %v1232_v37, %v1105_v55  ;;  %vm1237_vm8 = vcmp.lt.s32.totalorder %v1234_v10, %v1107_v32  ;;  %v2730_v23 = vmov 0.0   ;;  %v5141_v15 = vmov 1.0  }
 0x1fd   : > { %v3637_v17 = vsel %vm1308_vm4, 1.0, %v2730_v23  ;;  %2468 = vmatpush.msk.msra.mxu2 %vm1308_vm4, %v5141_v15  ;;  %v3641_v43 = vsel %vm1340_vm10, 1.0, %v2730_v23  ;;  %2484 = vmatpush.msk.msra.mxu3 %vm1340_vm10, %v5141_v15  ;;  %v1236_v19 = vsel %vm1235_vm2, %v1232_v37, %v1105_v55  ;;  %v1238_v31 = vsel %vm1237_vm8, %v1234_v10, %v1107_v32 }
 0x1fe   : > { %5268 = vst [vmem:[#allocation5_spill] sm:$0xff] %v3637_v17  ;;  %vm5130_vm14 = vcmp.eq.s32.totalorder %v5255_v56, %v3624_v29  ;;  %vm5133_vm13 = vcmp.eq.s32.totalorder %v3453_v51, %v3624_v29  ;;  %vm1071_vm5 = vcmp.eq.f32.partialorder %v5270_v16, %v3349_v49  ;;  %vm1239_vm11 = vcmp.lt.s32.totalorder %v1236_v19, %v1109_v42 }
 0x1ff   : > { %5269 = vst [vmem:[#allocation6_spill] sm:$0xff] %v3641_v43  ;;  %vm1241_vm0 = vcmp.lt.s32.totalorder %v1238_v31, %v1111_v38  ;;  %2469 = vmatpush.msk.msra.mxu2 %vm5130_vm14, %v5141_v15  ;;  %2485 = vmatpush.msk.msra.mxu3 %vm5133_vm13, %v5141_v15  ;;  %vm5271_vm4 = vcmp.eq.f32.partialorder %v5221_v59, %v3349_v49  ;;  %v1117_v32 = vsel %vm1053_vm7, %v3317_v35, 256  ;;  %v1119_v0 = vsel %vm1055_vm9, %v5274_v53, 256 }
 0x200   : > { %v1113_v18 = vsel %vm5271_vm4, %v3311_v33, 256  ;;  %vm5273_vm10 = vcmp.eq.f32.partialorder %v5272_v24, %v3349_v49  ;;  %v1240_v55 = vsel %vm1239_vm11, %v1236_v19, %v1109_v42  ;;  %v1242_v44 = vsel %vm1241_vm0, %v1238_v31, %v1111_v38 }
 0x201   : > { %v1115_v9 = vsel %vm5273_vm10, %v3314_v45, 256  ;;  %vm1243_vm2 = vcmp.lt.s32.totalorder %v1240_v55, %v1113_v18  ;;  %v1121_v59 = vsel %vm1057_vm3, %v5231_v40, 256  ;;  %vm5129_vm0 = vcmp.eq.s32.totalorder %v5252_v46, %v3624_v29 }
 0x202   : > { %vm1245_vm8 = vcmp.lt.s32.totalorder %v1242_v44, %v1115_v9  ;;  %v1244_v61 = vsel %vm1243_vm2, %v1240_v55, %v1113_v18  ;;  %v1123_v54 = vsel %vm1059_vm6, %v5232_v12, 256  ;;  %2470 = vmatpush.msk.msra.mxu2 %vm5129_vm0, %v5141_v15  ;;  %vm1336_vm9 = vcmp.eq.s32.totalorder %v3450_v62, %v3624_v29 }
 0x203   : > { %v1246_v42 = vsel %vm1245_vm8, %v1242_v44, %v1115_v9  ;;  %vm1247_vm7 = vcmp.lt.s32.totalorder %v1244_v61, %v1117_v32  ;;  %v1125_v34 = vsel %vm1061_vm12, %v5275_v3, 256  ;;  %2486 = vmatpush.msk.msra.mxu3 %vm1336_vm9, %v5141_v15  ;;  %vm5135_vm3 = vcmp.eq.s32.totalorder %v5249_v58, %v3624_v29 }
 0x204   : > { %vm1249_vm11 = vcmp.lt.s32.totalorder %v1246_v42, %v1119_v0  ;;  %v1248_v38 = vsel %vm1247_vm7, %v1244_v61, %v1117_v32  ;;  %v1127_v28 = vsel %vm1063_vm15, %v3332_v5, 256  ;;  %2471 = vmatpush.msk.msra.mxu2 %vm5135_vm3, %v5141_v15  ;;  %vm1334_vm12 = vcmp.eq.s32.totalorder %v5236_v21, %v3624_v29 }
 0x205   : > { %v1250_v6 = vsel %vm1249_vm11, %v1246_v42, %v1119_v0  ;;  %vm1251_vm6 = vcmp.lt.s32.totalorder %v1248_v38, %v1121_v59  ;;  %v1129_v36 = vsel %vm1065_vm1, %v5236_v21, 256  ;;  %2487 = vmatpush.msk.msra.mxu3 %vm1334_vm12, %v5141_v15  ;;  %vm5132_vm15 = vcmp.eq.s32.totalorder %v3284_v57, %v3624_v29 }
 0x206   : > { %vm1253_vm4 = vcmp.lt.s32.totalorder %v1250_v6, %v1123_v54  ;;  %v1252_v52 = vsel %vm1251_vm6, %v1248_v38, %v1121_v59  ;;  %vm5276_vm10 = vcmp.eq.f32.partialorder %v5266_v50, %v3349_v49  ;;  %2472 = vmatpush.msk.msra.mxu2 %vm5132_vm15, %v5141_v15  ;;  %vm5134_vm1 = vcmp.eq.s32.totalorder %v3332_v5, %v3624_v29 }
 0x207   : > { %v1254_v37 = vsel %vm1253_vm4, %v1250_v6, %v1123_v54  ;;  %v1131_v7 = vsel %vm5276_vm10, %v3450_v62, 256  ;;  %vm1255_vm2 = vcmp.lt.s32.totalorder %v1252_v52, %v1125_v34  ;;  %vm5277_vm7 = vcmp.eq.f32.partialorder %v5267_v4, %v3349_v49  ;;  %2488 = vmatpush.msk.msra.mxu3 %vm5134_vm1, %v5141_v15 }
 0x208   : > { %vm1257_vm8 = vcmp.lt.s32.totalorder %v1254_v37, %v1127_v28  ;;  %v1133_v14 = vsel %vm5277_vm7, %v3453_v51, 256  ;;  %v1256_v10 = vsel %vm1255_vm2, %v1252_v52, %v1125_v34  ;;  %vm5131_vm11 = vcmp.eq.s32.totalorder %v3281_v47, %v3624_v29 }
 0x209   : > { %v1258_v19 = vsel %vm1257_vm8, %v1254_v37, %v1127_v28  ;;  %v1135_v50 = vsel %vm1071_vm5, %v3464_v41, 256  ;;  %vm1259_vm6 = vcmp.lt.s32.totalorder %v1256_v10, %v1129_v36  ;;  %2473 = vmatpush.msk.msra.mxu2 %vm5131_vm11, %v5141_v15  ;;  %vm1330_vm10 = vcmp.eq.s32.totalorder %v5275_v3, %v3624_v29 }
 0x20a   : > { %vm1261_vm4 = vcmp.lt.s32.totalorder %v1258_v19, %v1131_v7  ;;  %v1260_v4 = vsel %vm1259_vm6, %v1256_v10, %v1129_v36  ;;  %vm5139_vm2 = vcmp.eq.s32.totalorder %v3211_v20, %v3624_v29  ;;  %2489 = vmatpush.msk.msra.mxu3 %vm1330_vm10, %v5141_v15  ;;  %vm1296_vm5 = vcmp.eq.s32.totalorder %v3278_v26, %v3624_v29 }
 0x20b   : > { %v1262_v31 = vsel %vm1261_vm4, %v1258_v19, %v1131_v7  ;;  %vm1263_vm8 = vcmp.lt.s32.totalorder %v1260_v4, %v1133_v14  ;;  %vm5136_vm0 = vcmp.eq.s32.totalorder %v3206_v22, %v3624_v29  ;;  %2474 = vmatpush.msk.msra.mxu2 %vm1296_vm5, %v5141_v15  ;;  %vm1328_vm6 = vcmp.eq.s32.totalorder %v5232_v12, %v3624_v29 }
 0x20c   : > { %vm1265_vm7 = vcmp.lt.s32.totalorder %v1262_v31, %v1135_v50  ;;  %v1264_v49 = vsel %vm1263_vm8, %v1260_v4, %v1133_v14  ;;  %vm5137_vm4 = vcmp.eq.s32.totalorder %v3203_v2, %v3624_v29  ;;  %2490 = vmatpush.msk.msra.mxu3 %vm1328_vm6, %v5141_v15  ;;  %vm1294_vm14 = vcmp.eq.s32.totalorder %v3275_v25, %v3624_v29 }
 0x20d   : > { %v1266_v16 = vsel %vm1265_vm7, %v1262_v31, %v1135_v50  ;;  %vm5140_vm15 = vcmp.eq.s32.totalorder %v3214_v48, %v3624_v29  ;;  %vm1288_vm13 = vcmp.eq.s32.totalorder %v3260_v27, %v3624_v29  ;;  %2475 = vmatpush.msk.msra.mxu2 %vm1294_vm14, %v5141_v15  ;;  %vm1326_vm8 = vcmp.eq.s32.totalorder %v5231_v40, %v3624_v29 }
 0x20e   : > { %vm1267_vm11 = vcmp.lt.s32.totalorder %v1264_v49, %v1266_v16  ;;  %vm1286_vm7 = vcmp.eq.s32.totalorder %v3217_v8, %v3624_v29  ;;  %2491 = vmatpush.msk.msra.mxu3 %vm1326_vm8, %v5141_v15  ;;  %vm1292_vm1 = vcmp.eq.s32.totalorder %v3272_v60, %v3624_v29  ;;  %vm1290_vm3 = vcmp.eq.s32.totalorder %v3269_v30, %v3624_v29 }
 0x20f   : > { %v1268_v18 = vsel %vm1267_vm11, %v1264_v49, %v1266_v16  ;;  %v3798_v9 = vsel %vm5139_vm2, 1.0, %v2730_v23  ;;  %2476 = vmatpush.msk.msra.mxu2 %vm1292_vm1, %v5141_v15  ;;  %vm5138_vm11 = vcmp.eq.s32.totalorder %v5274_v53, %v3624_v29  ;;  %v3810_v55 = vsel %vm5136_vm0, 1.0, %v2730_v23 }
 0x210   : > { %v1269_v24 = vrot.slane %v1268_v18, 4  ;;  %v3816_v44 = vsel %vm5137_vm4, 1.0, %v2730_v23  ;;  %v3822_v32 = vsel %vm5140_vm15, 1.0, %v2730_v23  ;;  %v3828_v0 = vsel %vm1288_vm13, 1.0, %v2730_v23  ;;  %2492 = vmatpush.msk.msra.mxu3 %vm5138_vm11, %v5141_v15 }
 0x211   : > { %v3838_v59 = vsel %vm1286_vm7, 1.0, %v2730_v23  ;;  %2477 = vmatpush.msk.msra.mxu2 %vm1290_vm3, %v5141_v15  ;;  %vm1322_vm4 = vcmp.eq.s32.totalorder %v3317_v35, %v3624_v29  ;;  %v3844_v61 = vsel %vm1290_vm3, 1.0, %v2730_v23  ;;  %vm1320_vm11 = vcmp.eq.s32.totalorder %v3314_v45, %v3624_v29 }
 0x212   : > { %vm1270_vm0 = vcmp.lt.s32.totalorder %v1268_v18, %v1269_v24  ;;  %2493 = vmatpush.msk.msra.mxu3 %vm1322_vm4, %v5141_v15  ;;  %vm1318_vm2 = vcmp.eq.s32.totalorder %v3311_v33, %v3624_v29  ;;  %vm1314_vm15 = vcmp.eq.s32.totalorder %v3305_v63, %v3624_v29  ;;  %v3866_v34 = vsel %vm1330_vm10, 1.0, %v2730_v23 }
 0x213   : > { %v1271_v42 = vsel %vm1270_vm0, %v1268_v18, %v1269_v24  ;;  %2478 = vmatpush.msk.msra.mxu2 %vm1288_vm13, %v5141_v15  ;;  %vm1312_vm0 = vcmp.eq.s32.totalorder %v3302_v13, %v3624_v29  ;;  %v3872_v38 = vsel %vm1328_vm6, 1.0, %v2730_v23  ;;  %v3882_v6 = vsel %vm1336_vm9, 1.0, %v2730_v23 }
 0x214   : > { %v1272_v54 = vrot.slane %v1271_v42, 2  ;;  %2494 = vmatpush.msk.msra.mxu3 %vm1320_vm11, %v5141_v15  ;;  %v3888_v28 = vsel %vm1334_vm12, 1.0, %v2730_v23  ;;  %v3894_v36 = vsel %vm1296_vm5, 1.0, %v2730_v23  ;;  %vm5280_vm13 = vcmp.eq.s32.totalorder %v5249_v58, %v3624_v29 }
 0x215   : > { %5278 = vst [vmem:[#allocation7_spill] sm:$0xff] %v3888_v28  ;;  %v3900_v52 = vsel %vm5280_vm13, 1.0, %v2730_v23  ;;  %2479 = vmatpush.msk.msra.mxu2 %vm1286_vm7, %v5141_v15  ;;  %v3910_v37 = vsel %vm1314_vm15, 1.0, %v2730_v23  ;;  %v3916_v7 = vsel %vm1320_vm11, 1.0, %v2730_v23  ;;  %v3922_v14 = vsel %vm1326_vm8, 1.0, %v2730_v23 }
 0x216   : > { %5279 = vst [vmem:[#allocation8_spill] sm:$0xff] %v3894_v36  ;;  %vm1273_vm9 = vcmp.lt.s32.totalorder %v1271_v42, %v1272_v54  ;;  %2495 = vmatpush.msk.msra.mxu3 %vm1318_vm2, %v5141_v15  ;;  %vm1310_vm3 = vcmp.eq.s32.totalorder %v3299_v11, %v3624_v29  ;;  %vm5285_vm12 = vcmp.eq.s32.totalorder %v3332_v5, %v3624_v29  ;;  %v2420_v31 = vsel %vm1294_vm14, 1.0, %v2730_v23 }
 0x217   : > { %5281 = vst [vmem:[#allocation9_spill] sm:$0xff] %v3900_v52  ;;  %v1274_v10 = vsel %vm1273_vm9, %v1271_v42, %v1272_v54  ;;  %v3934_v19 = vsel %vm5285_vm12, 1.0, %v2730_v23  ;;  %vm5287_vm10 = vcmp.eq.s32.totalorder %v3453_v51, %v3624_v29  ;;  %v2418_v49 = vsel %vm1292_vm1, 1.0, %v2730_v23 }
 0x218   : > { %5282 = vst [vmem:[#allocation10_spill] sm:$0xff] %v3910_v37  ;;  %v3940_v50 = vsel %vm5287_vm10, 1.0, %v2730_v23  ;;  %v1275_v4 = vrot.slane %v1274_v10, 1  ;;  %vm5289_vm5 = vcmp.eq.s32.totalorder %v3214_v48, %v3624_v29  ;;  %vm1316_vm6 = vcmp.eq.s32.totalorder %v3308_v1, %v3624_v29 }
 0x219   : > { %5283 = vst [vmem:[#allocation13_spill] sm:$0xff] %v3916_v7  ;;  %2480 = vmatpush.msk.msra.mxu2 %vm5289_vm5, %v5141_v15  ;;  %2496 = vmatpush.msk.msra.mxu3 %vm1316_vm6, %v5141_v15  ;;  %vm5290_vm8 = vcmp.eq.s32.totalorder %v3284_v57, %v3624_v29  ;;  %vm5291_vm14 = vcmp.eq.s32.totalorder %v3281_v47, %v3624_v29  ;;  %v3985_v54 = vsel %vm1312_vm0, 1.0, %v2730_v23  ;;  %v4006_v7 = vsel %vm1316_vm6, 1.0, %v2730_v23 }
 0x21a   : > { %5284 = vst [vmem:[#allocation14_spill] sm:$0xff] %v3922_v14  ;;  %v2426_v16 = vsel %vm5290_vm8, 1.0, %v2730_v23  ;;  %v2424_v18 = vsel %vm5291_vm14, 1.0, %v2730_v23  ;;  %vm5292_vm1 = vcmp.eq.s32.totalorder %v5255_v56, %v3624_v29  ;;  %vm5293_vm7 = vcmp.eq.s32.totalorder %v5252_v46, %v3624_v29 }
 0x21b   : > { %5286 = vst [vmem:[#allocation15_spill] sm:$0xff] %v3934_v19  ;;  %v3969_v24 = vsel %vm5292_vm1, 1.0, %v2730_v23  ;;  %v3975_v42 = vsel %vm5293_vm7, 1.0, %v2730_v23  ;;  %vm1276_vm11 = vcmp.lt.s32.totalorder %v1274_v10, %v1275_v4  ;;  %vm5294_vm13 = vcmp.eq.s32.totalorder %v3211_v20, %v3624_v29  ;;  %2497 = vmatpush.msk.msra.mxu3 %vm1314_vm15, %v5141_v15 }
 0x21c   : > { %5288 = vst [vmem:[#allocation16_spill] sm:$0xff] %v3940_v50  ;;  %2481 = vmatpush.msk.msra.mxu2 %vm5294_vm13, %v5141_v15  ;;  %v3991_v50 = vsel %vm1310_vm3, 1.0, %v2730_v23  ;;  %v3997_v19 = vsel %vm1318_vm2, 1.0, %v2730_v23  ;;  %v3999_v14 = vsel %vm1276_vm11, %v1274_v10, %v1275_v4  ;;  %vm5295_vm9 = vcmp.eq.s32.totalorder %v5274_v53, %v3624_v29 }
 0x21d   : > { %v4012_v37 = vsel %vm5295_vm9, 1.0, %v2730_v23  ;;  %v4018_v10 = vsel %vm1322_vm4, 1.0, %v2730_v23  ;;  %vm5147_vm2 = vcmp.eq.s32.totalorder %v3211_v20, %v3999_v14  ;;  %vm5146_vm15 = vcmp.eq.s32.totalorder %v3206_v22, %v3999_v14 }
 0x21e   : > { %vm5145_vm12 = vcmp.eq.s32.totalorder %v3203_v2, %v3999_v14  ;;  %vm5148_vm10 = vcmp.eq.s32.totalorder %v3214_v48, %v3999_v14  ;;  %vm5296_vm5 = vcmp.eq.s32.totalorder %v3206_v22, %v3624_v29  ;;  %v2409_v4 = vsel %vm5147_vm2, 1.0, %v2730_v23 }
 0x21f   : > { %2482 = vmatpush.msk.msra.mxu2 %vm5296_vm5, %v5141_v15  ;;  %v2407_v17 = vsel %vm5146_vm15, 1.0, %v2730_v23  ;;  %v2405_v52 = vsel %vm5145_vm12, 1.0, %v2730_v23  ;;  %v2411_v15 = vsel %vm5148_vm10, 1.0, %v2730_v23  ;;  %v5297_v36 = vmov 1.0  }
 0x220   : > { %2498 = vmatpush.msk.msra.mxu3 %vm1312_vm0, %v5297_v36  ;;  %v1990_v20 = vadd.f32 %v2409_v4, %v3798_v9  ;;  %v1987_v22 = vadd.f32 %v2407_v17, %v3810_v55  ;;  %v1984_v43 = vadd.f32 %v2405_v52, %v3816_v44  ;;  %v1993_v28 = vadd.f32 %v2411_v15, %v3822_v32  ;;  %v4075_v17 = vld [vmem:[%s5050_s2] sm:$0xff]  ;;  %v4080_v15 = vld [vmem:[%s5050_s2 + $0x8] sm:$0xff] }
 0x221   : > { %vm5298_vm4 = vcmp.eq.s32.totalorder %v3203_v2, %v3624_v29  ;;  %vm5150_vm6 = vcmp.eq.s32.totalorder %v3260_v27, %v3999_v14  ;;  %vm5149_vm8 = vcmp.eq.s32.totalorder %v3217_v8, %v3999_v14  ;;  %vm5151_vm0 = vcmp.eq.s32.totalorder %v3269_v30, %v3999_v14 }
 0x222   : > { %2483 = vmatpush.msk.msra.mxu2 %vm5298_vm4, %v5297_v36  ;;  %vm5153_vm14 = vcmp.eq.s32.totalorder %v3275_v25, %v3999_v14  ;;  %2499 = vmatpush.msk.msra.mxu3 %vm1310_vm3, %v5297_v36  ;;  %v2415_v9 = vsel %vm5150_vm6, 1.0, %v2730_v23  ;;  %v2413_v55 = vsel %vm5149_vm8, 1.0, %v2730_v23  ;;  %v2417_v44 = vsel %vm5151_vm0, 1.0, %v2730_v23 }
 0x223   : > { %1991 = vadd.xlane.f32.xlu2 %v1990_v20  ;;  %1988 = vadd.xlane.f32.xlu1 %v1987_v22  ;;  %v2421_v22 = vsel %vm5153_vm14, 1.0, %v2730_v23  ;;  %v1999_v20 = vadd.f32 %v2415_v9, %v3828_v0  ;;  %v1996_v32 = vadd.f32 %v2413_v55, %v3838_v59  ;;  %v4101_v52 = vadd.f32 %v2417_v44, %v3844_v61  ;;  %v4175_v44 = vld [vmem:[%s5050_s2 + $0x18] sm:$0xff] }
 0x224   : > { %1985 = vadd.xlane.f32.xlu0 %v1984_v43  ;;  %v4103_v4 = vadd.f32 %v2421_v22, %v2420_v31  ;;  %vm5152_vm3 = vcmp.eq.s32.totalorder %v3272_v60, %v3999_v14  ;;  %vm1301_vm1 = vcmp.eq.s32.totalorder %v3284_v57, %v3999_v14  ;;  %vm5155_vm7 = vcmp.eq.s32.totalorder %v3281_v47, %v3999_v14 }
 0x225   : > { %1486 = vmatmul.f32.vlgmr.msra.gmra.mxu2 %v4075_v17  ;;  %1551 = vmatmul.f32.vlgmr.msra.gmra.mxu3 %v4080_v15  ;;  %v1762_v43 = vrot.slane %v3999_v14, 7  ;;  %v2419_v0 = vsel %vm5152_vm3, 1.0, %v2730_v23  ;;  %v2427_v59 = vsel %vm1301_vm1, 1.0, %v2730_v23  ;;  %v2425_v61 = vsel %vm5155_vm7, 1.0, %v2730_v23 }
 0x226   : > { %vm1309_vm11 = vcmp.eq.s32.totalorder %v3296_v39, %v3999_v14  ;;  %v4128_v31 = vadd.f32 %v2419_v0, %v2418_v49  ;;  %v4130_v9 = vadd.f32 %v2427_v59, %v2426_v16  ;;  %v4132_v55 = vadd.f32 %v2425_v61, %v2424_v18  ;;  %v5307_v39 = vld [vmem:[#allocation5_spill] sm:$0xff] }
 0x227   : > { %2500 = vmatpush.msk.msrb.mxu2 %vm1309_vm11, %v5297_v36  ;;  %vm1341_vm13 = vcmp.eq.s32.totalorder %v3464_v41, %v3999_v14  ;;  %vm1307_vm9 = vcmp.eq.s32.totalorder %v5255_v56, %v3999_v14  ;;  %vm5154_vm5 = vcmp.eq.s32.totalorder %v3453_v51, %v3999_v14  ;;  %vm1337_vm4 = vcmp.eq.s32.totalorder %v3450_v62, %v3999_v14 }
 0x228   : > { %2516 = vmatpush.msk.msrb.mxu3 %vm1341_vm13, %v5297_v36  ;;  %vm1305_vm12 = vcmp.eq.s32.totalorder %v5252_v46, %v3999_v14  ;;  %v2433_v49 = vsel %vm1307_vm9, 1.0, %v2730_v23  ;;  %vm1303_vm15 = vcmp.eq.s32.totalorder %v5249_v58, %v3999_v14  ;;  %vm1335_vm2 = vcmp.eq.s32.totalorder %v5236_v21, %v3999_v14  ;;  %v4327_v21 = vld [vmem:[%s5050_s2 + $0x28] sm:$0xff]  ;;  %v4656_v46 = vld [vmem:[%s5050_s2 + $0xf0] sm:$0xff] }
 0x229   : > { %2501 = vmatpush.msk.msrb.mxu2 %vm1307_vm9, %v5297_v36  ;;  %v2431_v16 = vsel %vm1305_vm12, 1.0, %v2730_v23  ;;  %v4167_v56 = vadd.f32 %v2433_v49, %v3969_v24  ;;  %vm1333_vm9 = vcmp.eq.s32.totalorder %v3332_v5, %v3999_v14  ;;  %vm1331_vm10 = vcmp.eq.s32.totalorder %v5275_v3, %v3999_v14  ;;  %v4184_v24 = vld [vmem:[%s5050_s2 + $0x10] sm:$0xff] }
 0x22a   : > { %2517 = vmatpush.msk.msrb.mxu3 %vm5154_vm5, %v5297_v36  ;;  %v4170_v18 = vadd.f32 %v2431_v16, %v3975_v42  ;;  %vm1329_vm8 = vcmp.eq.s32.totalorder %v5232_v12, %v3999_v14  ;;  %vm5156_vm6 = vcmp.eq.s32.totalorder %v3302_v13, %v3999_v14  ;;  %vm1297_vm0 = vcmp.eq.s32.totalorder %v3278_v26, %v3999_v14  ;;  %v5303_v3 = vld [vmem:[#allocation6_spill] sm:$0xff]  ;;  %v5316_v26 = vld [vmem:[#allocation16_spill] sm:$0xff] }
 0x22b   : > { %1994 = vadd.xlane.f32.xlu2 %v1993_v28  ;;  %2000 = vadd.xlane.f32.xlu1 %v1999_v20  ;;  %v2457_v28 = vsel %vm1331_vm10, 1.0, %v2730_v23  ;;  %v2439_v42 = vsel %vm5156_vm6, 1.0, %v2730_v23  ;;  %vm5157_vm3 = vcmp.eq.s32.totalorder %v3299_v11, %v3999_v14  ;;  %vm1325_vm5 = vcmp.eq.s32.totalorder %v5274_v53, %v3999_v14  ;;  %v4603_v53 = vld [vmem:[%s5050_s2 + $0xb8] sm:$0xff] }
 0x22c   : > { %1997 = vadd.xlane.f32.xlu0 %v1996_v32  ;;  %2518 = vmatpush.msk.msrb.mxu3 %vm1337_vm4, %v5297_v36  ;;  %v4216_v22 = vadd.f32 %v2439_v42, %v3985_v54  ;;  %v2437_v20 = vsel %vm5157_vm3, 1.0, %v2730_v23  ;;  %vm1323_vm6 = vcmp.eq.s32.totalorder %v3317_v35, %v3999_v14  ;;  %v5299_v32 = vlaneseq  ;;  %v4497_v35 = vld [vmem:[%s5050_s2 + $0x40] sm:$0xff] }
 0x22d   : > { %2502 = vmatpush.msk.msrb.mxu2 %vm1305_vm12, %v5297_v36  ;;  %1554 = vmatmul.f32.gmra.mxu3 %v4175_v44  ;;  %v4237_v54 = vadd.f32 %v2437_v20, %v3991_v50  ;;  %vm1319_vm12 = vcmp.eq.s32.totalorder %v3311_v33, %v3999_v14  ;;  %vm1317_vm3 = vcmp.eq.s32.totalorder %v3308_v1, %v3999_v14  ;;  %v2451_v0 = vsel %vm1325_vm5, 1.0, %v2730_v23  ;;  %v4487_v33 = vld [vmem:[%s5050_s2 + $0x48] sm:$0xff] }
 0x22e   : > { %vm4227_vm14 = vcmp.lt.s32.totalorder %v5299_v32, 256  ;;  %2519 = vmatpush.msk.msrb.mxu3 %vm1335_vm2, %v5297_v36  ;;  %1489 = vmatmul.f32.gmra.mxu2 %v4184_v24  ;;  %v2445_v50 = vsel %vm1319_vm12, 1.0, %v2730_v23  ;;  %v2443_v59 = vsel %vm1317_vm3, 1.0, %v2730_v23  ;;  %vm1315_vm7 = vcmp.eq.s32.totalorder %v3305_v63, %v3999_v14  ;;  %v5328_v1 = vld [vmem:[#allocation37_spill] sm:$0xff]  ;;  %v4521_v63 = vld [vmem:[%s5050_s2 + $0x58] sm:$0xff] }
 0x22f   : > { %2503 = vmatpush.msk.msrb.mxu2 %vm1303_vm15, %v5297_v36  ;;  %v4262_v61 = vadd.f32 %v2451_v0, %v4012_v37  ;;  %v4270_v49 = vadd.f32 %v2445_v50, %v3997_v19  ;;  %v4273_v16 = vadd.f32 %v2443_v59, %v4006_v7  ;;  %v2449_v42 = vsel %vm1323_vm6, 1.0, %v2730_v23  ;;  %v5305_v50 = vld [vmem:[#allocation8_spill] sm:$0xff]  ;;  %v5306_v59 = vld [vmem:[#allocation9_spill] sm:$0xff] }
 0x230   : > { %2520 = vmatpush.msk.msrb.mxu3 %vm1333_vm9, %v5297_v36  ;;  %v4280_v37 = vadd.f32 %v2457_v28, %v3866_v34  ;;  %v4287_v20 = vadd.f32 %v2449_v42, %v4018_v10  ;;  %v2455_v7 = vsel %vm1329_vm8, 1.0, %v2730_v23  ;;  %v2463_v19 = vsel %vm1337_vm4, 1.0, %v2730_v23  ;;  %v5302_v28 = vld [vmem:[#allocation7_spill] sm:$0xff] }
 0x231   : > { %2504 = vmatpush.msk.msrb.mxu2 %vm1301_vm1, %v5297_v36  ;;  %v2461_v34 = vsel %vm1335_vm2, 1.0, %v2730_v23  ;;  %v4306_v57 = vadd.f32 %v2455_v7, %v3872_v38  ;;  %v4309_v10 = vadd.f32 %v2463_v19, %v3882_v6  ;;  %v2467_v62 = vsel %vm1341_vm13, 1.0, %v2730_v23 }
 0x232   : > { %2521 = vmatpush.msk.msrb.mxu3 %vm1331_vm10, %v5297_v36  ;;  %v4312_v0 = vadd.f32 %v2461_v34, %v5302_v28  ;;  %v4330_v38 = vadd.f32 %v2467_v62, %v5303_v3  ;;  %v2423_v41 = vsel %vm1297_vm0, 1.0, %v2730_v23  ;;  %v2429_v6 = vsel %vm1303_vm15, 1.0, %v2730_v23  ;;  %v5311_v62 = vld [vmem:[#allocation13_spill] sm:$0xff] }
 0x233   : > { %2003 = vadd.xlane.f32.xlu2 %v4101_v52  ;;  %2009 = vadd.xlane.f32.xlu1 %v4103_v4  ;;  %v2435_v52 = vsel %vm1309_vm11, 1.0, %v2730_v23  ;;  %vm5304_vm2 = vcmp.eq.s32.totalorder %v3281_v47, %v3999_v14  ;;  %v4352_v4 = vld [vmem:[%s5050_s2 + $0x20] sm:$0xff]  ;;  %v4355_v58 = vadd.f32 %v2423_v41, %v5305_v50  ;;  %v4358_v42 = vadd.f32 %v2429_v6, %v5306_v59  ;;  %v5312_v41 = vld [vmem:[#allocation14_spill] sm:$0xff] }
 0x234   : > { %2006 = vadd.xlane.f32.xlu0 %v4128_v31  ;;  %2505 = vmatpush.msk.msrb.mxu2 %vm5304_vm2, %v5297_v36  ;;  %v4361_v7 = vadd.f32 %v2435_v52, %v5307_v39  ;;  %v2441_v47 = vsel %vm1315_vm7, 1.0, %v2730_v23  ;;  %v5308_v31 = vld [vmem:[#allocation10_spill] sm:$0xff]  ;;  %vm5309_vm15 = vcmp.eq.s32.totalorder %v3314_v45, %v3999_v14  ;;  %vm5310_vm10 = vcmp.eq.s32.totalorder %v5231_v40, %v3999_v14  ;;  %v5313_v52 = vld [vmem:[#allocation15_spill] sm:$0xff] }
 0x235   : > { %2522 = vmatpush.msk.msrb.mxu3 %vm1329_vm8, %v5297_v36  ;;  %v4372_v19 = vadd.f32 %v2441_v47, %v5308_v31  ;;  %v2447_v34 = vsel %vm5309_vm15, 1.0, %v2730_v23  ;;  %v2453_v28 = vsel %vm5310_vm10, 1.0, %v2730_v23  ;;  %v2459_v12 = vsel %vm1333_vm9, 1.0, %v2730_v23  ;;  %v5325_v45 = vld [vmem:[#allocation38_spill] sm:$0xff] }
 0x236   : > { %2506 = vmatpush.msk.msrb.mxu2 %vm1297_vm0, %v5297_v36  ;;  %1557 = vmatmul.f32.gmra.mxu3 %v4327_v21  ;;  %v4392_v3 = vadd.f32 %v2447_v34, %v5311_v62  ;;  %v4395_v6 = vadd.f32 %v2453_v28, %v5312_v41  ;;  %v4398_v50 = vadd.f32 %v2459_v12, %v5313_v52  ;;  %vm5315_vm0 = vmmov %vm5310_vm10  ;;  %vm5317_vm1 = vcmask 1040384   ;;  %v4583_v40 = vld [vmem:[%s5050_s2 + $0x90] sm:$0xff] }
 0x237   : > { %vm5314_vm8 = vcmp.eq.s32.totalorder %v3453_v51, %v3999_v14  ;;  %2523 = vmatpush.msk.msrb.mxu3 %vm5315_vm0, %v5297_v36  ;;  %1492 = vmatmul.f32.gmra.mxu2 %v4352_v4  ;;  %v1764_v39 = vsel %vm5317_vm1, %v3624_v29, %v1762_v43  ;;  %vm5318_vm11 = vcmp.eq.s32.totalorder %v3275_v25, %v3999_v14  ;;  %v4441_v25 = vld [vmem:[%s5050_s2 + $0x38] sm:$0xff]  ;;  %v4590_v29 = vld [vmem:[%s5050_s2 + $0xa8] sm:$0xff]  ;;  %v4620_v43 = vld [vmem:[%s5050_s2 + $0xc0] sm:$0xff] }
 0x238   : > { %v2465_v5 = vsel %vm5314_vm8, 1.0, %v2730_v23  ;;  %2507 = vmatpush.msk.msrb.mxu2 %vm5318_vm11, %v5297_v36  ;;  %1769 = vst.msk [vmem:[%s285_s16] sm:$0x3] %vm4227_vm14, %v1764_v39  ;;  %vm5319_vm13 = vcmp.eq.s32.totalorder %v3272_v60, %v3999_v14  ;;  %vm5320_vm14 = vcmp.eq.s32.totalorder %v3269_v30, %v3999_v14  ;;  %v4451_v60 = vld [vmem:[%s5050_s2 + $0x30] sm:$0xff]  ;;  %vm5323_vm4 = vcmp.eq.s32.totalorder %v3217_v8, %v3999_v14  ;;  %v4569_v30 = vld [vmem:[%s5050_s2 + $0x80] sm:$0xff]  ;;  %v4577_v51 = vld [vmem:[%s5050_s2 + $0x98] sm:$0xff] }
 0x239   : > { %v4410_v59 = vadd.f32 %v2465_v5, %v5316_v26  ;;  %2524 = vmatpush.msk.msrb.mxu3 %vm1325_vm5, %v5297_v36  ;;  %vm5322_vm5 = vcmp.eq.s32.totalorder %v3260_v27, %v3999_v14  ;;  %vm5324_vm9 = vcmp.eq.s32.totalorder %v3214_v48, %v3999_v14  ;;  %vm5330_vm2 = vcmp.eq.s32.totalorder %v3299_v11, %v3999_v14  ;;  %v4535_v11 = vld [vmem:[%s5050_s2 + $0x68] sm:$0xff]  ;;  %v4549_v48 = vld [vmem:[%s5050_s2 + $0x78] sm:$0xff]  ;;  %v4555_v8 = vld [vmem:[%s5050_s2 + $0x70] sm:$0xff] }
 0x23a   : > { %2508 = vmatpush.msk.msrb.mxu2 %vm5319_vm13, %v5297_v36  ;;  %v4563_v27 = vld [vmem:[%s5050_s2 + $0x88] sm:$0xff]  ;;  %v4596_v23 = vld [vmem:[%s5050_s2 + $0xa0] sm:$0xff] }
 0x23b   : > { %2018 = vadd.xlane.f32.xlu1 %v4130_v9  ;;  %2525 = vmatpush.msk.msrb.mxu3 %vm1323_vm6, %v5297_v36  ;;  %vm5321_vm6 = vmmov %vm5309_vm15  ;;  %vm5331_vm15 = vcmp.eq.s32.totalorder %v3203_v2, %v3999_v14  ;;  %v4541_v2 = vld [vmem:[%s5050_s2 + $0x60] sm:$0xff]  ;;  %v4627_v9 = vld [vmem:[%s5050_s2 + $0xd8] sm:$0xff] }
 0x23c   : > { %2015 = vadd.xlane.f32.xlu0 %v4132_v55  ;;  %2509 = vmatpush.msk.msrb.mxu2 %vm5320_vm14, %v5297_v36  ;;  %v4632_v55 = vld [vmem:[%s5050_s2 + $0xd0] sm:$0xff] }
 0x23d   : > { %2526 = vmatpush.msk.msrb.mxu3 %vm5321_vm6, %v5297_v36 }
 0x23e   : > { %2510 = vmatpush.msk.msrb.mxu2 %vm5322_vm5, %v5297_v36  ;;  %1560 = vmatmul.f32.gmra.mxu3 %v4441_v25 }
 0x23f   : > { %2527 = vmatpush.msk.msrb.mxu3 %vm1319_vm12, %v5297_v36  ;;  %1495 = vmatmul.f32.gmra.mxu2 %v4451_v60  ;;  %vm5329_vm12 = vcmp.eq.s32.totalorder %v5328_v1, %v3999_v14 }
 0x240   : > { %2511 = vmatpush.msk.msrb.mxu2 %vm5323_vm4, %v5297_v36 }
 0x241   : > { %2528 = vmatpush.msk.msrb.mxu3 %vm1317_vm3, %v5297_v36  ;;  %vm5326_vm3 = vcmp.eq.s32.totalorder %v5325_v45, %v3999_v14 }
 0x242   : > { %2512 = vmatpush.msk.msrb.mxu2 %vm5324_vm9, %v5297_v36 }
 0x243   : > { %2027 = vadd.xlane.f32.xlu1 %v4167_v56  ;;  %2529 = vmatpush.msk.msrb.mxu3 %vm1315_vm7, %v5297_v36  ;;  %vm5327_vm7 = vcmp.eq.s32.totalorder %v3302_v13, %v3999_v14  ;;  %v4527_v13 = vld [vmem:[%s5050_s2 + $0x50] sm:$0xff]  ;;  %v4615_v14 = vld [vmem:[%s5050_s2 + $0xc8] sm:$0xff] }
 0x244   : > { %2024 = vadd.xlane.f32.xlu0 %v4170_v18  ;;  %2513 = vmatpush.msk.msrb.mxu2 %vm5326_vm3, %v5297_v36  ;;  %v4639_v56 = vld [vmem:[%s5050_s2 + $0xe8] sm:$0xff]  ;;  %v4644_v18 = vld [vmem:[%s5050_s2 + $0xe0] sm:$0xff] }
 0x245   : > { %2530 = vmatpush.msk.msrb.mxu3 %vm5327_vm7, %v5297_v36 }
 0x246   : > { %2514 = vmatpush.msk.msrb.mxu2 %vm5329_vm12, %v5297_v36  ;;  %1563 = vmatmul.f32.gmra.mxu3 %v4487_v33 }
 0x247   : > { %2531 = vmatpush.msk.msrb.mxu3 %vm5330_vm2, %v5297_v36  ;;  %1498 = vmatmul.f32.gmra.mxu2 %v4497_v35 }
 0x248   : > { %2515 = vmatpush.msk.msrb.mxu2 %vm5331_vm15, %v5297_v36  ;;  %v4608_v36 = vld [vmem:[%s5050_s2 + $0xb0] sm:$0xff] }
 0x24b   : > { %2036 = vadd.xlane.f32.xlu1 %v4216_v22  ;;  %v4651_v22 = vld [vmem:[%s5050_s2 + $0xf8] sm:$0xff] }
 0x24c   : > { %2033 = vadd.xlane.f32.xlu0 %v4237_v54 }
 0x24e   : > { %1566 = vmatmul.f32.gmra.mxu3 %v4521_v63 }
 0x24f   : > { %1501 = vmatmul.f32.gmra.mxu2 %v4527_v13 }
 0x253   : > { %2045 = vadd.xlane.f32.xlu1 %v4270_v49 }
 0x254   : > { %2042 = vadd.xlane.f32.xlu0 %v4273_v16 }
 0x256   : > { %1569 = vmatmul.f32.gmra.mxu3 %v4535_v11 }
 0x257   : > { %1504 = vmatmul.f32.gmra.mxu2 %v4541_v2 }
 0x25b   : > { %2054 = vadd.xlane.f32.xlu1 %v4262_v61 }
 0x25c   : > { %2051 = vadd.xlane.f32.xlu0 %v4287_v20 }
 0x25e   : > { %1572 = vmatmul.f32.gmra.mxu3 %v4549_v48 }
 0x25f   : > { %1507 = vmatmul.f32.gmra.mxu2 %v4555_v8 }
 0x263   : > { %2063 = vadd.xlane.f32.xlu1 %v4280_v37 }
 0x264   : > { %2060 = vadd.xlane.f32.xlu0 %v4306_v57 }
 0x266   : > { %1575 = vmatmul.f32.gmra.mxu3 %v4563_v27 }
 0x267   : > { %1510 = vmatmul.f32.gmra.mxu2 %v4569_v30 }
 0x26b   : > { %2072 = vadd.xlane.f32.xlu1 %v4309_v10 }
 0x26c   : > { %2069 = vadd.xlane.f32.xlu0 %v4312_v0 }
 0x26e   : > { %1578 = vmatmul.f32.gmra.mxu3 %v4577_v51 }
 0x26f   : > { %1513 = vmatmul.f32.gmra.mxu2 %v4583_v40 }
 0x274   : > { %2078 = vadd.xlane.f32.xlu0 %v4330_v38 }
 0x276   : > { %1581 = vmatmul.f32.gmra.mxu3 %v4590_v29 }
 0x277   : > { %1516 = vmatmul.f32.gmra.mxu2 %v4596_v23 }
 0x27e   : > { %1584 = vmatmul.f32.gmra.mxu3 %v4603_v53 }
 0x27f   : > { %1519 = vmatmul.f32.gmra.mxu2 %v4608_v36 }
 0x286   : > { %1587 = vmatmul.f32.gmra.mxu3 %v4615_v14 }
 0x287   : > { %1522 = vmatmul.f32.gmra.mxu2 %v4620_v43 }
 0x28e   : > { %1590 = vmatmul.f32.gmra.mxu3 %v4627_v9 }
 0x28f   : > { %1525 = vmatmul.f32.gmra.mxu2 %v4632_v55 }
 0x296   : > { %1593 = vmatmul.f32.gmra.mxu3 %v4639_v56 }
 0x297   : > { %1528 = vmatmul.f32.gmra.mxu2 %v4644_v18 }
 0x29e   : > { %1596 = vmatmul.f32.gmra.mxu3 %v4651_v22 }
 0x29f   : > { %1531 = vmatmul.f32.gmra.mxu2 %v4656_v46 }
 0x2a6   : > { %1681 = vmatmul.f32.vlgmr.msrb.gmra.mxu3 %v4080_v15 }
 0x2a7   : > { %1616 = vmatmul.f32.vlgmr.msrb.gmra.mxu2 %v4075_v17 }
 0x2a8   : > { %v1487_v54 = vpop.f32.mrf.mxu2  ;;  %v1552_v61 = vpop.f32.mrf.mxu3 }
 0x2a9   : > { %v4669_v49 = vadd.f32 %v1552_v61, %v1487_v54  ;;  %v2618_v54 = vld [vmem:[%s2832_s15 + $0x10] sm:$0xff] }
 0x2ab   : > { %1730 = vst [vmem:[%s4667_s13] sm:$0xff] %v4669_v49 }
 0x2ae   : > { %1684 = vmatmul.f32.gmra.mxu3 %v4175_v44 }
 0x2af   : > { %1619 = vmatmul.f32.gmra.mxu2 %v4184_v24 }
 0x2b0   : > { %v1555_v17 = vpop.f32.mrf.mxu3 }
 0x2b1   : > { %v1490_v15 = vpop.f32.mrf.mxu2 }
 0x2b2   : > { %v4675_v16 = vadd.f32 %v1555_v17, %v1490_v15 }
 0x2b4   : > { %1732 = vst [vmem:[%s4667_s13 + $0x10] sm:$0xff] %v4675_v16 }
 0x2b6   : > { %1687 = vmatmul.f32.gmra.mxu3 %v4327_v21 }
 0x2b7   : > { %1622 = vmatmul.f32.gmra.mxu2 %v4352_v4 }
 0x2b9   : > { %v1558_v37 = vpop.f32.mrf.mxu3 }
 0x2ba   : > { %v1493_v20 = vpop.f32.mrf.mxu2 }
 0x2bb   : > { %v4681_v57 = vadd.f32 %v1558_v37, %v1493_v20 }
 0x2bd   : > { %1734 = vst [vmem:[%s4667_s13 + $0x20] sm:$0xff] %v4681_v57 }
 0x2be   : > { %1690 = vmatmul.f32.gmra.mxu3 %v4441_v25 }
 0x2bf   : > { %1625 = vmatmul.f32.gmra.mxu2 %v4451_v60 }
 0x2c1   : > { %v1561_v44 = vpop.f32.mrf.mxu3 }
 0x2c2   : > { %v1496_v24 = vpop.f32.mrf.mxu2 }
 0x2c3   : > { %v4687_v10 = vadd.f32 %v1561_v44, %v1496_v24 }
 0x2c5   : > { %1736 = vst [vmem:[%s4667_s13 + $0x30] sm:$0xff] %v4687_v10 }
 0x2c6   : > { %1693 = vmatmul.f32.gmra.mxu3 %v4487_v33 }
 0x2c7   : > { %1628 = vmatmul.f32.gmra.mxu2 %v4497_v35 }
 0x2c9   : > { %v1564_v0 = vpop.f32.mrf.mxu3 }
 0x2ca   : > { %v1499_v21 = vpop.f32.mrf.mxu2 }
 0x2cb   : > { %v4693_v38 = vadd.f32 %v1564_v0, %v1499_v21 }
 0x2cd   : > { %1738 = vst [vmem:[%s4667_s13 + $0x40] sm:$0xff] %v4693_v38 }
 0x2ce   : > { %1696 = vmatmul.f32.gmra.mxu3 %v4521_v63 }
 0x2cf   : > { %1631 = vmatmul.f32.gmra.mxu2 %v4527_v13 }
 0x2d1   : > { %v1567_v4 = vpop.f32.mrf.mxu3 }
 0x2d2   : > { %v1502_v47 = vpop.f32.mrf.mxu2 }
 0x2d3   : > { %v4699_v31 = vadd.f32 %v1567_v4, %v1502_v47  ;;  %v2621_v47 = vld [vmem:[%s2832_s15 + $0x18] sm:$0xff] }
 0x2d5   : > { %1740 = vst [vmem:[%s4667_s13 + $0x50] sm:$0xff] %v4699_v31 }
 0x2d6   : > { %1699 = vmatmul.f32.gmra.mxu3 %v4535_v11 }
 0x2d7   : > { %1634 = vmatmul.f32.gmra.mxu2 %v4541_v2 }
 0x2d9   : > { %v1570_v34 = vpop.f32.mrf.mxu3 }
 0x2da   : > { %v1505_v28 = vpop.f32.mrf.mxu2 }
 0x2db   : > { %v4705_v12 = vadd.f32 %v1570_v34, %v1505_v28 }
 0x2dd   : > { %1742 = vst [vmem:[%s4667_s13 + $0x60] sm:$0xff] %v4705_v12 }
 0x2de   : > { %1702 = vmatmul.f32.gmra.mxu3 %v4549_v48 }
 0x2df   : > { %1637 = vmatmul.f32.gmra.mxu2 %v4555_v8 }
 0x2e1   : > { %v1573_v62 = vpop.f32.mrf.mxu3 }
 0x2e2   : > { %v1508_v41 = vpop.f32.mrf.mxu2 }
 0x2e3   : > { %v4711_v52 = vadd.f32 %v1573_v62, %v1508_v41 }
 0x2e5   : > { %1744 = vst [vmem:[%s4667_s13 + $0x70] sm:$0xff] %v4711_v52 }
 0x2e6   : > { %1705 = vmatmul.f32.gmra.mxu3 %v4563_v27 }
 0x2e7   : > { %1640 = vmatmul.f32.gmra.mxu2 %v4569_v30 }
 0x2e9   : > { %v1576_v5 = vpop.f32.mrf.mxu3 }
 0x2ea   : > { %v1511_v26 = vpop.f32.mrf.mxu2 }
 0x2eb   : > { %v4717_v39 = vadd.f32 %v1576_v5, %v1511_v26 }
 0x2ed   : > { %1746 = vst [vmem:[%s4667_s13 + $0x80] sm:$0xff] %v4717_v39 }
 0x2ee   : > { %1708 = vmatmul.f32.gmra.mxu3 %v4577_v51 }
 0x2ef   : > { %1643 = vmatmul.f32.gmra.mxu2 %v4583_v40 }
 0x2f1   : > { %v1579_v25 = vpop.f32.mrf.mxu3 }
 0x2f2   : > { %v1514_v60 = vpop.f32.mrf.mxu2 }
 0x2f3   : > { %v4723_v33 = vadd.f32 %v1579_v25, %v1514_v60  ;;  %v2622_v60 = vld [vmem:[%s2832_s15 + $0x30] sm:$0xff] }
 0x2f5   : > { %1748 = vst [vmem:[%s4667_s13 + $0x90] sm:$0xff] %v4723_v33 }
 0x2f6   : > { %1711 = vmatmul.f32.gmra.mxu3 %v4590_v29 }
 0x2f7   : > { %1646 = vmatmul.f32.gmra.mxu2 %v4596_v23 }
 0x2f9   : > { %v1582_v45 = vpop.f32.mrf.mxu3 }
 0x2fa   : > { %v1517_v35 = vpop.f32.mrf.mxu2 }
 0x2fb   : > { %v4729_v1 = vadd.f32 %v1582_v45, %v1517_v35  ;;  %v1789_v45 = vsub.f32 %v4687_v10, %v2622_v60  ;;  %v2623_v35 = vld [vmem:[%s2832_s15 + $0x28] sm:$0xff] }
 0x2fd   : > { %1750 = vst [vmem:[%s4667_s13 + $0xa0] sm:$0xff] %v4729_v1 }
 0x2fe   : > { %1714 = vmatmul.f32.gmra.mxu3 %v4603_v53 }
 0x2ff   : > { %1649 = vmatmul.f32.gmra.mxu2 %v4608_v36 }
 0x301   : > { %v1585_v63 = vpop.f32.mrf.mxu3 }
 0x302   : > { %v1520_v13 = vpop.f32.mrf.mxu2 }
 0x303   : > { %v4735_v11 = vadd.f32 %v1585_v63, %v1520_v13  ;;  %v1853_v13 = vmul.f32 %v1789_v45, %v1789_v45  ;;  %v2631_v45 = vld [vmem:[%s2832_s15 + $0x68] sm:$0xff] }
 0x305   : > { %1752 = vst [vmem:[%s4667_s13 + $0xb0] sm:$0xff] %v4735_v11 }
 0x306   : > { %1717 = vmatmul.f32.gmra.mxu3 %v4615_v14 }
 0x307   : > { %1652 = vmatmul.f32.gmra.mxu2 %v4620_v43 }
 0x309   : > { %v1588_v2 = vpop.f32.mrf.mxu3 }
 0x30a   : > { %v1523_v48 = vpop.f32.mrf.mxu2 }
 0x30b   : > { %v4741_v8 = vadd.f32 %v1588_v2, %v1523_v48 }
 0x30d   : > { %1754 = vst [vmem:[%s4667_s13 + $0xc0] sm:$0xff] %v4741_v8 }
 0x30e   : > { %1720 = vmatmul.f32.gmra.mxu3 %v4627_v9 }
 0x30f   : > { %1655 = vmatmul.f32.gmra.mxu2 %v4632_v55  ;;  %v2617_v55 = vld [vmem:[%s2832_s15] sm:$0xff] }
 0x311   : > { %v1591_v27 = vpop.f32.mrf.mxu3 }
 0x312   : > { %v1526_v30 = vpop.f32.mrf.mxu2 }
 0x313   : > { %v4747_v51 = vadd.f32 %v1591_v27, %v1526_v30 }
 0x315   : > { %1756 = vst [vmem:[%s4667_s13 + $0xd0] sm:$0xff] %v4747_v51 }
 0x316   : > { %1723 = vmatmul.f32.gmra.mxu3 %v4639_v56  ;;  %v1783_v56 = vsub.f32 %v4669_v49, %v2617_v55  ;;  %v2620_v49 = vld [vmem:[%s2832_s15 + $0x20] sm:$0xff] }
 0x317   : > { %1658 = vmatmul.f32.gmra.mxu2 %v4644_v18  ;;  %v1787_v4 = vsub.f32 %v4681_v57, %v2620_v49  ;;  %v2628_v49 = vld [vmem:[%s2832_s15 + $0x60] sm:$0xff] }
 0x318   : > { %v1847_v17 = vmul.f32 %v1783_v56, %v1783_v56 }
 0x319   : > { %v1594_v40 = vpop.f32.mrf.mxu3  ;;  %v1851_v28 = vmul.f32 %v1787_v4, %v1787_v4  ;;  %v1795_v4 = vsub.f32 %v4705_v12, %v2628_v49 }
 0x31a   : > { %v1529_v29 = vpop.f32.mrf.mxu2 }
 0x31b   : > { %v4753_v23 = vadd.f32 %v1594_v40, %v1529_v29  ;;  %v2624_v29 = vld [vmem:[%s2832_s15 + $0x40] sm:$0xff] }
 0x31d   : > { %1758 = vst [vmem:[%s4667_s13 + $0xe0] sm:$0xff] %v4753_v23 }
 0x31e   : > { %1726 = vmatmul.f32.gmra.mxu3 %v4651_v22  ;;  %v1785_v22 = vsub.f32 %v4675_v16, %v2618_v54 }
 0x31f   : > { %1661 = vmatmul.f32.gmra.mxu2 %v4656_v46  ;;  %v2619_v46 = vld [vmem:[%s2832_s15 + $0x8] sm:$0xff] }
 0x320   : > { %v1849_v37 = vmul.f32 %v1785_v22, %v1785_v22 }
 0x321   : > { %v1597_v53 = vpop.f32.mrf.mxu3 }
 0x322   : > { %v1532_v36 = vpop.f32.mrf.mxu2 }
 0x323   : > { %v4759_v14 = vadd.f32 %v1597_v53, %v1532_v36  ;;  %v1791_v53 = vsub.f32 %v4693_v38, %v2624_v29  ;;  %v2625_v36 = vld [vmem:[%s2832_s15 + $0x38] sm:$0xff] }
 0x324   : > { %v2633_v29 = vld [vmem:[%s2832_s15 + $0x78] sm:$0xff] }
 0x325   : > { %1760 = vst [vmem:[%s4667_s13 + $0xf0] sm:$0xff] %v4759_v14 }
 0x329   : > { %v1682_v43 = vpop.f32.mrf.mxu3 }
 0x32a   : > { %v1617_v9 = vpop.f32.mrf.mxu2 }
 0x32b   : > { %v1683_v18 = vadd.f32 %v1682_v43, %v1617_v9  ;;  %v1855_v9 = vmul.f32 %v1791_v53, %v1791_v53 }
 0x32d   : > { %1731 = vst [vmem:[%s4667_s13 + $0x8] sm:$0xff] %v1683_v18  ;;  %v1784_v61 = vsub.f32 %v1683_v18, %v2619_v46  ;;  %v2626_v46 = vld [vmem:[%s2832_s15 + $0x50] sm:$0xff] }
 0x32f   : > { %v1848_v15 = vmul.f32 %v1784_v61, %v1784_v61  ;;  %v1793_v61 = vsub.f32 %v4699_v31, %v2626_v46 }
 0x331   : > { %v1879_v20 = vadd.f32 %v1848_v15, %v1847_v17  ;;  %v1685_v44 = vpop.f32.mrf.mxu3  ;;  %v2627_v17 = vld [vmem:[%s2832_s15 + $0x48] sm:$0xff] }
 0x332   : > { %v1620_v24 = vpop.f32.mrf.mxu2 }
 0x333   : > { %v1686_v0 = vadd.f32 %v1685_v44, %v1620_v24  ;;  %v1880_v21 = vadd.f32 %v1879_v20, %v1849_v37  ;;  %v1857_v37 = vmul.f32 %v1793_v61, %v1793_v61 }
 0x335   : > { %1733 = vst [vmem:[%s4667_s13 + $0x18] sm:$0xff] %v1686_v0  ;;  %v1786_v16 = vsub.f32 %v1686_v0, %v2621_v47  ;;  %v2629_v47 = vld [vmem:[%s2832_s15 + $0x58] sm:$0xff] }
 0x337   : > { %v1850_v34 = vmul.f32 %v1786_v16, %v1786_v16 }
 0x339   : > { %v1881_v62 = vadd.f32 %v1880_v21, %v1850_v34  ;;  %v1688_v41 = vpop.f32.mrf.mxu3  ;;  %v1859_v34 = vmul.f32 %v1795_v4, %v1795_v4 }
 0x33a   : > { %v1623_v5 = vpop.f32.mrf.mxu2 }
 0x33b   : > { %v1689_v26 = vadd.f32 %v1688_v41, %v1623_v5  ;;  %v1882_v25 = vadd.f32 %v1881_v62, %v1851_v28 }
 0x33d   : > { %1735 = vst [vmem:[%s4667_s13 + $0x28] sm:$0xff] %v1689_v26  ;;  %v1788_v63 = vsub.f32 %v1689_v26, %v2623_v35 }
 0x33f   : > { %v1852_v57 = vmul.f32 %v1788_v63, %v1788_v63 }
 0x341   : > { %v1883_v2 = vadd.f32 %v1882_v25, %v1852_v57  ;;  %v1691_v48 = vpop.f32.mrf.mxu3  ;;  %v2630_v25 = vld [vmem:[%s2832_s15 + $0x70] sm:$0xff] }
 0x342   : > { %v1626_v27 = vpop.f32.mrf.mxu2  ;;  %v1797_v60 = vsub.f32 %v4711_v52, %v2630_v25 }
 0x343   : > { %v1692_v30 = vadd.f32 %v1691_v48, %v1626_v27  ;;  %v1884_v40 = vadd.f32 %v1883_v2, %v1853_v13 }
 0x344   : > { %v1861_v63 = vmul.f32 %v1797_v60, %v1797_v60 }
 0x345   : > { %1737 = vst [vmem:[%s4667_s13 + $0x38] sm:$0xff] %v1692_v30  ;;  %v1790_v43 = vsub.f32 %v1692_v30, %v2625_v36  ;;  %v2632_v30 = vld [vmem:[%s2832_s15 + $0x80] sm:$0xff] }
 0x347   : > { %v1854_v10 = vmul.f32 %v1790_v43, %v1790_v43 }
 0x349   : > { %v1885_v55 = vadd.f32 %v1884_v40, %v1854_v10  ;;  %v1694_v56 = vpop.f32.mrf.mxu3  ;;  %v1799_v40 = vsub.f32 %v4717_v39, %v2632_v30 }
 0x34a   : > { %v1629_v18 = vpop.f32.mrf.mxu2 }
 0x34b   : > { %v1695_v54 = vadd.f32 %v1694_v56, %v1629_v18  ;;  %v1886_v22 = vadd.f32 %v1885_v55, %v1855_v9  ;;  %v1863_v36 = vmul.f32 %v1799_v40, %v1799_v40  ;;  %v2634_v18 = vld [vmem:[%s2832_s15 + $0x90] sm:$0xff] }
 0x34d   : > { %1739 = vst [vmem:[%s4667_s13 + $0x48] sm:$0xff] %v1695_v54  ;;  %v1792_v15 = vsub.f32 %v1695_v54, %v2627_v17  ;;  %v1801_v54 = vsub.f32 %v4723_v33, %v2634_v18 }
 0x34f   : > { %v1856_v38 = vmul.f32 %v1792_v15, %v1792_v15  ;;  %v1865_v61 = vmul.f32 %v1801_v54, %v1801_v54 }
 0x351   : > { %v1887_v20 = vadd.f32 %v1886_v22, %v1856_v38  ;;  %v1697_v44 = vpop.f32.mrf.mxu3  ;;  %v2635_v22 = vld [vmem:[%s2832_s15 + $0x88] sm:$0xff] }
 0x352   : > { %v1632_v24 = vpop.f32.mrf.mxu2 }
 0x353   : > { %v1698_v0 = vadd.f32 %v1697_v44, %v1632_v24  ;;  %v1888_v21 = vadd.f32 %v1887_v20, %v1857_v37  ;;  %v2636_v44 = vld [vmem:[%s2832_s15 + $0xa0] sm:$0xff] }
 0x354   : > { %v1803_v24 = vsub.f32 %v4729_v1, %v2636_v44 }
 0x355   : > { %1741 = vst [vmem:[%s4667_s13 + $0x58] sm:$0xff] %v1698_v0  ;;  %v1794_v16 = vsub.f32 %v1698_v0, %v2629_v47  ;;  %v2637_v0 = vld [vmem:[%s2832_s15 + $0x98] sm:$0xff] }
 0x356   : > { %v1867_v49 = vmul.f32 %v1803_v24, %v1803_v24 }
 0x357   : > { %v1858_v31 = vmul.f32 %v1794_v16, %v1794_v16 }
 0x359   : > { %v1889_v28 = vadd.f32 %v1888_v21, %v1858_v31  ;;  %v1700_v62 = vpop.f32.mrf.mxu3 }
 0x35a   : > { %v1635_v41 = vpop.f32.mrf.mxu2 }
 0x35b   : > { %v1701_v5 = vadd.f32 %v1700_v62, %v1635_v41  ;;  %v1890_v26 = vadd.f32 %v1889_v28, %v1859_v34  ;;  %v2638_v28 = vld [vmem:[%s2832_s15 + $0xb0] sm:$0xff]  ;;  %v2639_v41 = vld [vmem:[%s2832_s15 + $0xa8] sm:$0xff] }
 0x35c   : > { %v1805_v62 = vsub.f32 %v4735_v11, %v2638_v28 }
 0x35d   : > { %1743 = vst [vmem:[%s4667_s13 + $0x68] sm:$0xff] %v1701_v5  ;;  %v1796_v35 = vsub.f32 %v1701_v5, %v2631_v45 }
 0x35f   : > { %v1860_v12 = vmul.f32 %v1796_v35, %v1796_v35 }
 0x361   : > { %v1891_v57 = vadd.f32 %v1890_v26, %v1860_v12  ;;  %v1703_v13 = vpop.f32.mrf.mxu3  ;;  %v1869_v26 = vmul.f32 %v1805_v62, %v1805_v62  ;;  %v2648_v62 = vld [vmem:[%s2832_s15 + $0xf8] sm:$0xff] }
 0x362   : > { %v1638_v2 = vpop.f32.mrf.mxu2 }
 0x363   : > { %v1704_v48 = vadd.f32 %v1703_v13, %v1638_v2  ;;  %v1892_v27 = vadd.f32 %v1891_v57, %v1861_v63  ;;  %v2640_v63 = vld [vmem:[%s2832_s15 + $0xc0] sm:$0xff]  ;;  %v2641_v13 = vld [vmem:[%s2832_s15 + $0xb8] sm:$0xff] }
 0x364   : > { %v1807_v57 = vsub.f32 %v4741_v8, %v2640_v63 }
 0x365   : > { %1745 = vst [vmem:[%s4667_s13 + $0x78] sm:$0xff] %v1704_v48  ;;  %v1798_v53 = vsub.f32 %v1704_v48, %v2633_v29 }
 0x366   : > { %v1871_v48 = vmul.f32 %v1807_v57, %v1807_v57 }
 0x367   : > { %v1862_v52 = vmul.f32 %v1798_v53, %v1798_v53 }
 0x369   : > { %v1893_v43 = vadd.f32 %v1892_v27, %v1862_v52  ;;  %v1706_v10 = vpop.f32.mrf.mxu3  ;;  %v2642_v52 = vld [vmem:[%s2832_s15 + $0xd0] sm:$0xff] }
 0x36a   : > { %v1641_v9 = vpop.f32.mrf.mxu2 }
 0x36b   : > { %v1707_v55 = vadd.f32 %v1706_v10, %v1641_v9  ;;  %v1894_v56 = vadd.f32 %v1893_v43, %v1863_v36  ;;  %v1809_v36 = vsub.f32 %v4747_v51, %v2642_v52  ;;  %v2643_v43 = vld [vmem:[%s2832_s15 + $0xc8] sm:$0xff] }
 0x36d   : > { %1747 = vst [vmem:[%s4667_s13 + $0x88] sm:$0xff] %v1707_v55  ;;  %v1800_v46 = vsub.f32 %v1707_v55, %v2635_v22  ;;  %v1873_v9 = vmul.f32 %v1809_v36, %v1809_v36 }
 0x36f   : > { %v1864_v39 = vmul.f32 %v1800_v46, %v1800_v46  ;;  %v2644_v46 = vld [vmem:[%s2832_s15 + $0xe0] sm:$0xff] }
 0x371   : > { %v1895_v17 = vadd.f32 %v1894_v56, %v1864_v39  ;;  %v1709_v15 = vpop.f32.mrf.mxu3  ;;  %v1811_v39 = vsub.f32 %v4753_v23, %v2644_v46 }
 0x372   : > { %v1644_v38 = vpop.f32.mrf.mxu2 }
 0x373   : > { %v1710_v37 = vadd.f32 %v1709_v15, %v1644_v38  ;;  %v1896_v20 = vadd.f32 %v1895_v17, %v1865_v61  ;;  %v2645_v61 = vld [vmem:[%s2832_s15 + $0xd8] sm:$0xff]  ;;  %v1875_v15 = vmul.f32 %v1811_v39, %v1811_v39 }
 0x375   : > { %1749 = vst [vmem:[%s4667_s13 + $0x98] sm:$0xff] %v1710_v37  ;;  %v1802_v21 = vsub.f32 %v1710_v37, %v2637_v0  ;;  %v2646_v0 = vld [vmem:[%s2832_s15 + $0xf0] sm:$0xff] }
 0x377   : > { %v1866_v33 = vmul.f32 %v1802_v21, %v1802_v21  ;;  %v1813_v21 = vsub.f32 %v4759_v14, %v2646_v0 }
 0x379   : > { %v1897_v4 = vadd.f32 %v1896_v20, %v1866_v33  ;;  %v1712_v47 = vpop.f32.mrf.mxu3  ;;  %v2647_v33 = vld [vmem:[%s2832_s15 + $0xe8] sm:$0xff]  ;;  %v1877_v23 = vmul.f32 %v1813_v21, %v1813_v21 }
 0x37a   : > { %v1647_v16 = vpop.f32.mrf.mxu2 }
 0x37b   : > { %v1713_v31 = vadd.f32 %v1712_v47, %v1647_v16  ;;  %v1898_v34 = vadd.f32 %v1897_v4, %v1867_v49 }
 0x37d   : > { %1751 = vst [vmem:[%s4667_s13 + $0xa8] sm:$0xff] %v1713_v31  ;;  %v1804_v5 = vsub.f32 %v1713_v31, %v2639_v41 }
 0x37f   : > { %v1868_v1 = vmul.f32 %v1804_v5, %v1804_v5 }
 0x381   : > { %v1899_v25 = vadd.f32 %v1898_v34, %v1868_v1  ;;  %v1715_v60 = vpop.f32.mrf.mxu3 }
 0x382   : > { %v1650_v45 = vpop.f32.mrf.mxu2 }
 0x383   : > { %v1716_v35 = vadd.f32 %v1715_v60, %v1650_v45  ;;  %v1900_v12 = vadd.f32 %v1899_v25, %v1869_v26 }
 0x385   : > { %1753 = vst [vmem:[%s4667_s13 + $0xb8] sm:$0xff] %v1716_v35  ;;  %v1806_v2 = vsub.f32 %v1716_v35, %v2641_v13 }
 0x387   : > { %v1870_v11 = vmul.f32 %v1806_v2, %v1806_v2 }
 0x389   : > { %v1901_v27 = vadd.f32 %v1900_v12, %v1870_v11  ;;  %v1718_v30 = vpop.f32.mrf.mxu3 }
 0x38a   : > { %v1653_v40 = vpop.f32.mrf.mxu2 }
 0x38b   : > { %v1719_v29 = vadd.f32 %v1718_v30, %v1653_v40  ;;  %v1902_v53 = vadd.f32 %v1901_v27, %v1871_v48 }
 0x38d   : > { %1755 = vst [vmem:[%s4667_s13 + $0xc8] sm:$0xff] %v1719_v29  ;;  %v1808_v10 = vsub.f32 %v1719_v29, %v2643_v43 }
 0x38f   : > { %v1872_v8 = vmul.f32 %v1808_v10, %v1808_v10 }
 0x391   : > { %v1903_v55 = vadd.f32 %v1902_v53, %v1872_v8  ;;  %v1721_v56 = vpop.f32.mrf.mxu3 }
 0x392   : > { %v1656_v18 = vpop.f32.mrf.mxu2 }
 0x393   : > { %v1722_v54 = vadd.f32 %v1721_v56, %v1656_v18  ;;  %v1904_v22 = vadd.f32 %v1903_v55, %v1873_v9 }
 0x395   : > { %1757 = vst [vmem:[%s4667_s13 + $0xd8] sm:$0xff] %v1722_v54  ;;  %v1810_v17 = vsub.f32 %v1722_v54, %v2645_v61 }
 0x397   : > { %v1874_v51 = vmul.f32 %v1810_v17, %v1810_v17 }
 0x399   : > { %v1905_v38 = vadd.f32 %v1904_v22, %v1874_v51  ;;  %v1724_v37 = vpop.f32.mrf.mxu3 }
 0x39a   : > { %v1659_v20 = vpop.f32.mrf.mxu2 }
 0x39b   : > { %v1725_v44 = vadd.f32 %v1724_v37, %v1659_v20  ;;  %v1906_v24 = vadd.f32 %v1905_v38, %v1875_v15 }
 0x39d   : > { %1759 = vst [vmem:[%s4667_s13 + $0xe8] sm:$0xff] %v1725_v44  ;;  %v1812_v49 = vsub.f32 %v1725_v44, %v2647_v33 }
 0x39f   : > { %v1876_v4 = vmul.f32 %v1812_v49, %v1812_v49 }
 0x3a1   : > { %v1907_v47 = vadd.f32 %v1906_v24, %v1876_v4  ;;  %v1727_v16 = vpop.f32.mrf.mxu3 }
 0x3a2   : > { %v1662_v31 = vpop.f32.mrf.mxu2 }
 0x3a3   : > { %v1728_v34 = vadd.f32 %v1727_v16, %v1662_v31  ;;  %v1908_v28 = vadd.f32 %v1907_v47, %v1877_v23 }
 0x3a5   : > { %1761 = vst [vmem:[%s4667_s13 + $0xf8] sm:$0xff] %v1728_v34  ;;  %v1814_v41 = vsub.f32 %v1728_v34, %v2648_v62 }
 0x3a7   : > { %v1878_v5 = vmul.f32 %v1814_v41, %v1814_v41 }
 0x3a9   : > { %v1909_v1 = vadd.f32 %v1908_v28, %v1878_v5 }
 0x3ab   : > { %1910 = vadd.xlane.f32.xlu2 %v1909_v1 }
 0x3b3   : > { %2012 = vadd.xlane.f32.xlu2 %v4355_v58  ;;  %v1992_v58 = vpop.xlane.xlu2 %1991 }
 0x3bb   : > { %2021 = vadd.xlane.f32.xlu2 %v4358_v42 }
 0x3c3   : > { %2030 = vadd.xlane.f32.xlu2 %v4361_v7 }
 0x3cb   : > { %2039 = vadd.xlane.f32.xlu2 %v4372_v19 }
 0x3d3   : > { %2048 = vadd.xlane.f32.xlu2 %v4392_v3 }
 0x3db   : > { %2057 = vadd.xlane.f32.xlu2 %v4395_v6 }
 0x3e3   : > { %2066 = vadd.xlane.f32.xlu2 %v4398_v50 }
 0x3eb   : > { %2075 = vadd.xlane.f32.xlu2 %v4410_v59 }
 0x3ec   : > { %2676 = shalt.err (!%p2673_p5)
}
 0x3ed   : > { %2556 = dma.vmem_to_hbm [thread:$0]  (%p2807_p4), %s2183_s17, 32, %s2185_s18, %s2158_s19   ;;  %v1995_v42 = vpop.xlane.xlu2 %1994  ;;  %v1986_v7 = vpop.xlane.xlu0 %1985  ;;  %v4855_v36 = vand.u32 127, %v5299_v32  ;;  %vm2115_vm0 = vcmask 64512  }
 0x3ee   : > { %v1989_v6 = vpop.xlane.xlu1 %1988  ;;  %s2338_s7 = sshll.u32 %s2719_s24, 5 }
 0x3ef   : > { %p317_p4 = scmp.lt.s32.totalorder %s2338_s7, 127  ;;  %vm2081_vm10 = vcmp.eq.s32.totalorder %v4855_v36, 1  ;;  %vm2080_vm8 = vcmp.eq.s32.totalorder %v4855_v36, 0 }
 0x3f1   : > { %s5340_s7 = smov (!%p317_p4, %s2338_s7), 127 }
 0x3f2   : > { %s2339_s27 = sshll.u32 %s5340_s7, 3 }
 0x3f3   : > { %s4862_s24 = scalar_lea.vmem %s5054_s6, %s2339_s27 }
 0x3f5   : > { %v2004_v19 = vpop.xlane.xlu2 %2003  ;;  %v1998_v59 = vpop.xlane.xlu0 %1997 }
 0x3f6   : > { %v2001_v45 = vpop.xlane.xlu1 %2000 }
 0x3fd   : > { %v2007_v12 = vpop.xlane.xlu0 %2006 }
 0x3fe   : > { %v2010_v63 = vpop.xlane.xlu1 %2009 }
 0x405   : > { %v2016_v13 = vpop.xlane.xlu0 %2015 }
 0x406   : > { %v2019_v2 = vpop.xlane.xlu1 %2018 }
 0x40d   : > { %v2025_v48 = vpop.xlane.xlu0 %2024 }
 0x40e   : > { %v2028_v27 = vpop.xlane.xlu1 %2027 }
 0x415   : > { %v2034_v40 = vpop.xlane.xlu0 %2033 }
 0x416   : > { %v2037_v29 = vpop.xlane.xlu1 %2036 }
 0x41d   : > { %v2043_v52 = vpop.xlane.xlu0 %2042 }
 0x41e   : > { %v1911_v3 = vpop.xlane.xlu2 %1910  ;;  %v2046_v43 = vpop.xlane.xlu1 %2045 }
 0x41f   : > { %v1912_v50 = vrot.slane %v1911_v3, 4 }
 0x421   : > { %v1913_v14 = vadd.f32 %v1912_v50, %v1911_v3 }
 0x423   : > { %v1914_v26 = vrot.slane %v1913_v14, 2 }
 0x425   : > { %v1915_v25 = vadd.f32 %v1914_v26, %v1913_v14  ;;  %v2052_v8 = vpop.xlane.xlu0 %2051 }
 0x426   : > { %v2013_v57 = vpop.xlane.xlu2 %2012  ;;  %v2055_v17 = vpop.xlane.xlu1 %2054 }
 0x427   : > { %v1916_v60 = vrot.slane %v1915_v25, 1 }
 0x429   : > { %v1917_v35 = vadd.f32 %v1916_v60, %v1915_v25 }
 0x42b   : > { %2554 = vpush %v1917_v35 }
 0x42d   : > { %v2061_v38 = vpop.xlane.xlu0 %2060 }
 0x42e   : > { %v2022_v11 = vpop.xlane.xlu2 %2021  ;;  %v2064_v23 = vpop.xlane.xlu1 %2063 }
 0x435   : > { %v2070_v31 = vpop.xlane.xlu0 %2069 }
 0x436   : > { %v2031_v30 = vpop.xlane.xlu2 %2030 }
 0x43d   : > { %v2079_v50 = vpop.xlane.xlu0 %2078 }
 0x43e   : > { %v2040_v53 = vpop.xlane.xlu2 %2039 }
 0x446   : > { %v2049_v10 = vpop.xlane.xlu2 %2048 }
 0x44e   : > { %v2058_v51 = vpop.xlane.xlu2 %2057 }
 0x456   : > { %v2067_v47 = vpop.xlane.xlu2 %2066 }
 0x45c   : > { %s2555_s16 = spop %2554 }
 0x45d   : > { %v1919_v32 = vstv %s2555_s16 }
 0x45e   : > { %v4864_v9 = vsel %vm2081_vm10, %v1919_v32, 0.0 }
 0x45f   : > { %v2083_v55 = vsel %vm2080_vm8, %v1986_v7, %v4864_v9  ;;  %v2084_v56 = vsel %vm2080_vm8, %v1989_v6, %v4864_v9  ;;  %v2085_v18 = vsel %vm2080_vm8, %v1992_v58, %v4864_v9  ;;  %v2086_v54 = vsel %vm2080_vm8, %v1995_v42, %v4864_v9  ;;  %v2076_v6 = vpop.xlane.xlu2 %2075 }
 0x460   : > { %2116 = vst.msk [vmem:[%s4862_s24] sm:$0xff] %vm2115_vm0, %v2083_v55  ;;  %v2087_v22 = vsel %vm2080_vm8, %v1998_v59, %v4864_v9  ;;  %v2088_v46 = vsel %vm2080_vm8, %v2001_v45, %v4864_v9  ;;  %v2089_v39 = vsel %vm2080_vm8, %v2004_v19, %v4864_v9  ;;  %v2090_v61 = vsel %vm2080_vm8, %v2007_v12, %v4864_v9  ;;  %v2073_v19 = vpop.xlane.xlu1 %2072 }
 0x461   : > { %2117 = vst.msk [vmem:[%s4862_s24 + $0x8] sm:$0xff] %vm2115_vm0, %v2084_v56  ;;  %v2091_v15 = vsel %vm2080_vm8, %v2010_v63, %v4864_v9  ;;  %v2092_v37 = vsel %vm2080_vm8, %v2013_v57, %v4864_v9  ;;  %v2093_v20 = vsel %vm2080_vm8, %v2016_v13, %v4864_v9  ;;  %v2094_v44 = vsel %vm2080_vm8, %v2019_v2, %v4864_v9 }
 0x462   : > { %2118 = vst.msk [vmem:[%s4862_s24 + $0x10] sm:$0xff] %vm2115_vm0, %v2085_v18  ;;  %v2095_v24 = vsel %vm2080_vm8, %v2022_v11, %v4864_v9  ;;  %v2096_v0 = vsel %vm2080_vm8, %v2025_v48, %v4864_v9  ;;  %v2097_v21 = vsel %vm2080_vm8, %v2028_v27, %v4864_v9  ;;  %v2098_v33 = vsel %vm2080_vm8, %v2031_v30, %v4864_v9 }
 0x463   : > { %2119 = vst.msk [vmem:[%s4862_s24 + $0x18] sm:$0xff] %vm2115_vm0, %v2086_v54  ;;  %v2099_v49 = vsel %vm2080_vm8, %v2034_v40, %v4864_v9  ;;  %v2100_v4 = vsel %vm2080_vm8, %v2037_v29, %v4864_v9  ;;  %v2101_v16 = vsel %vm2080_vm8, %v2040_v53, %v4864_v9  ;;  %v2102_v34 = vsel %vm2080_vm8, %v2043_v52, %v4864_v9 }
 0x464   : > { %2120 = vst.msk [vmem:[%s4862_s24 + $0x20] sm:$0xff] %vm2115_vm0, %v2087_v22  ;;  %v2103_v28 = vsel %vm2080_vm8, %v2046_v43, %v4864_v9  ;;  %v2104_v62 = vsel %vm2080_vm8, %v2049_v10, %v4864_v9  ;;  %v2105_v41 = vsel %vm2080_vm8, %v2052_v8, %v4864_v9  ;;  %v2106_v5 = vsel %vm2080_vm8, %v2055_v17, %v4864_v9 }
 0x465   : > { %2121 = vst.msk [vmem:[%s4862_s24 + $0x28] sm:$0xff] %vm2115_vm0, %v2088_v46  ;;  %v2107_v1 = vsel %vm2080_vm8, %v2058_v51, %v4864_v9  ;;  %v2108_v58 = vsel %vm2080_vm8, %v2061_v38, %v4864_v9  ;;  %v2109_v42 = vsel %vm2080_vm8, %v2064_v23, %v4864_v9  ;;  %v2110_v7 = vsel %vm2080_vm8, %v2067_v47, %v4864_v9 }
 0x466   : > { %2122 = vst.msk [vmem:[%s4862_s24 + $0x30] sm:$0xff] %vm2115_vm0, %v2089_v39  ;;  %v2111_v3 = vsel %vm2080_vm8, %v2070_v31, %v4864_v9  ;;  %v2112_v59 = vsel %vm2080_vm8, %v2073_v19, %v4864_v9  ;;  %v2114_v14 = vsel %vm2080_vm8, %v2079_v50, %v4864_v9  ;;  %v2113_v26 = vsel %vm2080_vm8, %v2076_v6, %v4864_v9 }
 0x467   : > { %2123 = vst.msk [vmem:[%s4862_s24 + $0x38] sm:$0xff] %vm2115_vm0, %v2090_v61 }
 0x468   : > { %2124 = vst.msk [vmem:[%s4862_s24 + $0x40] sm:$0xff] %vm2115_vm0, %v2091_v15 }
 0x469   : > { %2125 = vst.msk [vmem:[%s4862_s24 + $0x48] sm:$0xff] %vm2115_vm0, %v2092_v37 }
 0x46a   : > { %2126 = vst.msk [vmem:[%s4862_s24 + $0x50] sm:$0xff] %vm2115_vm0, %v2093_v20 }
 0x46b   : > { %2127 = vst.msk [vmem:[%s4862_s24 + $0x58] sm:$0xff] %vm2115_vm0, %v2094_v44 }
 0x46c   : > { %2128 = vst.msk [vmem:[%s4862_s24 + $0x60] sm:$0xff] %vm2115_vm0, %v2095_v24 }
 0x46d   : > { %2129 = vst.msk [vmem:[%s4862_s24 + $0x68] sm:$0xff] %vm2115_vm0, %v2096_v0 }
 0x46e   : > { %2130 = vst.msk [vmem:[%s4862_s24 + $0x70] sm:$0xff] %vm2115_vm0, %v2097_v21 }
 0x46f   : > { %2131 = vst.msk [vmem:[%s4862_s24 + $0x78] sm:$0xff] %vm2115_vm0, %v2098_v33 }
 0x470   : > { %2132 = vst.msk [vmem:[%s4862_s24 + $0x80] sm:$0xff] %vm2115_vm0, %v2099_v49 }
 0x471   : > { %2133 = vst.msk [vmem:[%s4862_s24 + $0x88] sm:$0xff] %vm2115_vm0, %v2100_v4 }
 0x472   : > { %2134 = vst.msk [vmem:[%s4862_s24 + $0x90] sm:$0xff] %vm2115_vm0, %v2101_v16 }
 0x473   : > { %2135 = vst.msk [vmem:[%s4862_s24 + $0x98] sm:$0xff] %vm2115_vm0, %v2102_v34 }
 0x474   : > { %2136 = vst.msk [vmem:[%s4862_s24 + $0xa0] sm:$0xff] %vm2115_vm0, %v2103_v28 }
 0x475   : > { %2137 = vst.msk [vmem:[%s4862_s24 + $0xa8] sm:$0xff] %vm2115_vm0, %v2104_v62 }
 0x476   : > { %2138 = vst.msk [vmem:[%s4862_s24 + $0xb0] sm:$0xff] %vm2115_vm0, %v2105_v41 }
 0x477   : > { %2139 = vst.msk [vmem:[%s4862_s24 + $0xb8] sm:$0xff] %vm2115_vm0, %v2106_v5 }
 0x478   : > { %2140 = vst.msk [vmem:[%s4862_s24 + $0xc0] sm:$0xff] %vm2115_vm0, %v2107_v1 }
 0x479   : > { %2141 = vst.msk [vmem:[%s4862_s24 + $0xc8] sm:$0xff] %vm2115_vm0, %v2108_v58 }
 0x47a   : > { %2142 = vst.msk [vmem:[%s4862_s24 + $0xd0] sm:$0xff] %vm2115_vm0, %v2109_v42 }
 0x47b   : > { %2143 = vst.msk [vmem:[%s4862_s24 + $0xd8] sm:$0xff] %vm2115_vm0, %v2110_v7 }
 0x47c   : > { %2144 = vst.msk [vmem:[%s4862_s24 + $0xe0] sm:$0xff] %vm2115_vm0, %v2111_v3 }
 0x47d   : > { %2145 = vst.msk [vmem:[%s4862_s24 + $0xe8] sm:$0xff] %vm2115_vm0, %v2112_v59 }
 0x47e   : > { %2147 = vst.msk [vmem:[%s4862_s24 + $0xf8] sm:$0xff] %vm2115_vm0, %v2114_v14 }
 0x47f   : > { %2146 = vst.msk [vmem:[%s4862_s24 + $0xf0] sm:$0xff] %vm2115_vm0, %v2113_v26 }
 0x480 PF: > { %p2562_p6 = scmp.ge.s32.totalorder %s2727_s26, 2  ;;  %s2213_s17 = sand.u32 1, %s2707_s21  }
 0x481   : > { %s2214_s18 = scalar_lea.sflag [#allocation3], %s2213_s17 }
 0x482   : > { %p2559_p7 = pnand %p2562_p6, %p2814_p8 }
 0x484   : > { %p2560_p9 = pneg %p2559_p7 }
 0x486   : > { %2702 = dma.done.wait (%p2560_p9), %s2214_s18, 32  }
 0x487   : > { %2704 = vsyncadd (%p2560_p9), %s2214_s18, 4294967264  ;;  %s20_s26 = sadd.s32 1, %s2727_s26   ;;  %s5332_s21 = smov %s2711_s22 }
 0x488   : > { %p17_p10 = scmp.ge.s32.totalorder %s20_s26, 6   ;;  %s5333_s22 = smov %s2715_s23 }
 0x489   : > { %s5334_s23 = smov %s2820_s10  ;;  %s5335_s24 = smov %s2723_s25 }
 0x48a   : > { %s5336_s25 = smov %s5338_s29  ;;  %19 = sbr.rel (!%p17_p10) target bundleno = 4 (0x4), region = 95 }
 0x48f   :  { %2229 = vsyncpa [#allocation3], 1 }
 0x490   :  { %2231 = vsyncpa [#allocation3 + $0x1], 1 }

</bundles_post_ra>
